<compile_context>
chip_gen: v7x
topology: tpu7x:2x2x1
jax: 0.10.0
libtpu: 0.0.40
codegen_flags: <defaults>
</compile_context>

<pallas_src>
import functools

import jax
import jax.numpy as jnp
from jax.experimental import pallas as pl
from jax.experimental.pallas import tpu as pltpu


# --------------------------------------------------------------------------
# Fused kernel: (Linear + CELU + GroupNorm) x4  +  SCAtt, per batch tile
# --------------------------------------------------------------------------
def _lrb_kernel(*refs, heads, head_dim, mid, seq, d, eps, shared_qv1, shared_kv2):
    it = iter(refs)
    x_ref = next(it)                                     # [bt, D]    bf16
    v1i_ref = None if shared_qv1 else next(it)           # [bt, D]    bf16 (only if value1 != x)
    k_ref = next(it)                                     # [bt, M, D] bf16
    v2i_ref = None if shared_kv2 else next(it)           # [bt, M, D] bf16 (only if value2 != key)
    m_ref = next(it)                                     # [bt, M]    f32
    wqv_ref, affqv_ref = next(it), next(it)              # [D, 2D] bf16, [3, 2D] f32
    wkv_ref, affkv_ref = next(it), next(it)              # [D, 2D] bf16, [3, 2D] f32
    seg_ref, exp_ref = next(it), next(it)                # [2D, 2H], [2H, 2D] f32
    w1_ref, b1_ref = next(it), next(it)                  # [D, H*MID] bf16, [1, H*MID] f32
    wl_ref, bl_ref = next(it), next(it)                  # [H*MID, H] bf16, [1, H] f32
    wl2_ref, bl2_ref = next(it), next(it)                # [H*MID, D] bf16, [1, D] f32
    o_ref = next(it)                                     # [bt, D] f32

    bt = x_ref.shape[0]
    n = bt * seq
    inv_dh = 1.0 / head_dim
    S2 = seg_ref[...]                                    # [2D, 2H] feature -> group indicator
    E2 = exp_ref[...]                                    # [2H, 2D] group -> feature broadcast
    EH = E2[:heads, :d]                                  # [H, D]   head  -> feature broadcast

    def proj_gn(inp, w, aff, S, E):
        """Linear + CELU(1) + GroupNorm on an [N, W] slab, groups vectorized via MXU."""
        y = jnp.dot(inp, w, preferred_element_type=jnp.float32) + aff[0:1, :]
        y = jnp.where(y > 0, y, jnp.exp(jnp.minimum(y, 0.0)) - 1.0)     # CELU(alpha=1)
        mean = jnp.dot(jnp.dot(y, S, preferred_element_type=jnp.float32) * inv_dh,
                       E, preferred_element_type=jnp.float32)
        dev = y - mean
        var = jnp.dot(dev * dev, S, preferred_element_type=jnp.float32) * inv_dh
        istd = jnp.dot(jax.lax.rsqrt(var + eps), E, preferred_element_type=jnp.float32)
        return dev * istd * aff[1:2, :] + aff[2:3, :]

    # --- projections (q/v1 and k/v2 each fused into one [.,D] x [D,2D] matmul when shared) ---
    if shared_qv1:
        qv1 = proj_gn(x_ref[...], wqv_ref[...], affqv_ref[...], S2, E2)         # [bt, 2D]
        q, v1 = qv1[:, :d], qv1[:, d:]
    else:
        S1, E1 = S2[:d, :heads], EH
        q = proj_gn(x_ref[...], wqv_ref[...][:, :d], affqv_ref[...][:, :d], S1, E1)
        v1 = proj_gn(v1i_ref[...], wqv_ref[...][:, d:], affqv_ref[...][:, d:], S1, E1)

    kin = k_ref[...].reshape(n, d)
    if shared_kv2:
        kv = proj_gn(kin, wkv_ref[...], affkv_ref[...], S2, E2)                 # [bt*M, 2D]
        kk, v2 = kv[:, :d], kv[:, d:]
    else:
        S1, E1 = S2[:d, :heads], EH
        kk = proj_gn(kin, wkv_ref[...][:, :d], affkv_ref[...][:, :d], S1, E1)
        v2 = proj_gn(v2i_ref[...].reshape(n, d), wkv_ref[...][:, d:],
                     affkv_ref[...][:, d:], S1, E1)

    # --- SCAtt, heads vectorized via block-diagonal (bf16) weights ---
    amap = (q[:, None, :] * kk.reshape(bt, seq, d)).reshape(n, d)               # q ⊙ k  (f32)
    hid = jnp.maximum(
        jnp.dot(amap.astype(w1_ref.dtype), w1_ref[...],
                preferred_element_type=jnp.float32) + b1_ref[...], 0.0)         # [n, H*MID] f32

    mask = m_ref[...]                                                           # [bt, M]
    mask3 = mask[:, :, None]                                                    # [bt, M, 1]
    logits = (jnp.dot(hid.astype(wl_ref.dtype), wl_ref[...],
                      preferred_element_type=jnp.float32)
              + bl_ref[...]).reshape(bt, seq, heads)                            # [bt, M, H]
    logits = jnp.where(mask3 == 0.0, -1e9, logits)
    logits = logits - jnp.max(logits, axis=1, keepdims=True)
    ex = jnp.exp(logits)
    a_sp = ex / jnp.sum(ex, axis=1, keepdims=True)                              # softmax over M

    # masked mean pool over M (matches reference: no clamp when a row is fully masked)
    msum = jnp.sum(mask, axis=1, keepdims=True)                                 # [bt, 1]
    pool = jnp.sum(hid.reshape(bt, seq, heads * mid) * mask3, axis=1) / msum    # [bt, H*MID]
    a_ch = jax.nn.sigmoid(
        jnp.dot(pool.astype(wl2_ref.dtype), wl2_ref[...],
                preferred_element_type=jnp.float32) + bl2_ref[...])             # [bt, D]

    # spatial attention applied to v2: broadcast per-head alpha to its Dh lanes via EH
    a_full = jnp.dot(a_sp.reshape(n, heads), EH, preferred_element_type=jnp.float32)  # [n, D]
    v2w = jnp.sum((a_full * v2).reshape(bt, seq, d), axis=1)                    # [bt, D]

    o_ref[...] = (v1 * v2w * a_ch).astype(o_ref.dtype)


# --------------------------------------------------------------------------
# Host-side helpers
# --------------------------------------------------------------------------
def prepare_constants(params, weight_dtype=jnp.bfloat16):
    """Precompute fused/block-diagonal constants ONCE per model (hoisted out of the forward)."""
    D = params['q'][0].shape[0]
    H = params['heads']
    dh = D // H
    sc = params['scatt']

    def cat(a, b):
        return jnp.concatenate([a, b], axis=1)

    w_qv1 = cat(params['q'][0], params['v1'][0]).astype(weight_dtype)           # [D, 2D]
    w_kv2 = cat(params['k'][0], params['v2'][0]).astype(weight_dtype)           # [D, 2D]

    def aff(pa, pb):                                                            # [3, 2D]: bias,γ,β
        return jnp.concatenate([cat(pa[1], pb[1]), cat(pa[2], pb[2]),
                                cat(pa[3], pb[3])], axis=0).astype(jnp.float32)

    eye_h = jnp.eye(H, dtype=jnp.float32)
    seg1 = jnp.repeat(eye_h, dh, axis=0)                                        # [D, H]
    seg2 = jnp.kron(jnp.eye(2, dtype=jnp.float32), seg1)                        # [2D, 2H]

    return dict(
        w_qv1=w_qv1, w_kv2=w_kv2,
        aff_qv1=aff(params['q'], params['v1']), aff_kv2=aff(params['k'], params['v2']),
        seg2=seg2, exp2=seg2.T,
        w1_bd=jnp.kron(eye_h, sc['w1']).astype(weight_dtype),                   # [D, H*MID]
        b1=jnp.tile(sc['b1'], (1, H)).astype(jnp.float32),                      # [1, H*MID]
        wl_bd=jnp.kron(eye_h, sc['wl']).astype(weight_dtype),                   # [H*MID, H]
        bl=jnp.tile(sc['bl'], (1, H)).astype(jnp.float32),                      # [1, H]
        wl2_bd=jnp.kron(eye_h, sc['wl2']).astype(weight_dtype),                 # [H*MID, D]
        bl2=jnp.tile(sc['bl2'], (1, H)).astype(jnp.float32),                    # [1, D]
    )


def _vmem_limit_bytes():
    try:
        cap = int(pltpu.get_tpu_info().vmem_capacity_bytes)   # 64 MiB v7x, 128 MiB v5e/v6e
    except Exception:
        cap = 64 << 20
    return int(min(max(cap - (16 << 20), 32 << 20), 96 << 20))


def _pick_batch_tile(B, M, D, hmid, vmem_limit, const_bytes):
    """VMEM-aware batch tile: bt*M >= ~512 matmul rows, >=2 grid steps when B is large,
    and per-step working set within the scoped-VMEM budget."""
    per_row = 2 * (2 * M * D)                  # streamed bf16 kv block, 2 pipeline buffers
    per_row += M * (2 * D) * 4                 # projected kv slab (f32, 2D wide)
    per_row += 2 * M * D * 4                   # q⊙k map + alpha-broadcast slab (f32)
    per_row += 2 * M * hmid * 4                # hid (+ ReLU temp)
    per_row += 16 * D * 4                      # per-row vectors / headroom
    budget = max(vmem_limit - 2 * const_bytes - (4 << 20), 1 << 20)
    bt = min(max(1, budget // max(per_row, 1)),          # VMEM cap
             max(-(-512 // M), 8))                        # feed the 256-wide MXU
    if B >= 16:
        bt = min(bt, B // 2)                   # keep >=2 grid steps for v7x's two TensorCores
    bt = int(max(1, min(bt, B)))
    while B % bt != 0:
        bt -= 1
    return bt


# --------------------------------------------------------------------------
# LowRankBilinearLayer.forward (inference, precompute=False)
# --------------------------------------------------------------------------
def lowrank_bilinear_layer(params, x, key=None, mask=None, value1=None, value2=None, consts=None):
    if key is None:
        key = x
    if value1 is None:
        value1 = x
    if value2 is None:
        value2 = x
    shared_qv1 = value1 is x
    shared_kv2 = value2 is key

    if key.ndim == 2:
        key = key[:, None, :]
        if shared_kv2:
            value2 = key
    if value2.ndim == 2 and not shared_kv2:
        value2 = value2[:, None, :]

    B, D = x.shape
    M = key.shape[1]
    H = params['heads']
    dh = D // H
    MID = params['scatt']['w1'].shape[1]
    if consts is None:
        consts = prepare_constants(params)

    if mask is None:
        mask = jnp.ones((B, M), jnp.float32)
    mask2 = mask.astype(jnp.float32).reshape(B, M)

    cdt = jnp.bfloat16
    const_arrays = [consts['w_qv1'], consts['aff_qv1'], consts['w_kv2'], consts['aff_kv2'],
                    consts['seg2'], consts['exp2'],
                    consts['w1_bd'], consts['b1'], consts['wl_bd'], consts['bl'],
                    consts['wl2_bd'], consts['bl2']]
    const_bytes = sum(int(a.size) * a.dtype.itemsize for a in const_arrays)

    vmem_limit = _vmem_limit_bytes()
    bt = _pick_batch_tile(B, M, D, H * MID, vmem_limit, const_bytes)

    # streamed data (key/value2 and x/value1 deduplicated when they alias)
    data_arrays = [x.astype(cdt)]
    data_specs = [pl.BlockSpec((bt, D), lambda b: (b, 0))]
    if not shared_qv1:
        data_arrays.append(value1.astype(cdt))
        data_specs.append(pl.BlockSpec((bt, D), lambda b: (b, 0)))
    data_arrays.append(key.astype(cdt))
    data_specs.append(pl.BlockSpec((bt, M, D), lambda b: (b, 0, 0)))
    if not shared_kv2:
        data_arrays.append(value2.astype(cdt))
        data_specs.append(pl.BlockSpec((bt, M, D), lambda b: (b, 0, 0)))
    data_arrays.append(mask2)
    data_specs.append(pl.BlockSpec((bt, M), lambda b: (b, 0)))

    kern = functools.partial(_lrb_kernel, heads=H, head_dim=dh, mid=MID, seq=M, d=D,
                             eps=1e-5, shared_qv1=shared_qv1, shared_kv2=shared_kv2)

    def _run(single_buffer_consts):
        cmode = dict(pipeline_mode=pl.Buffered(1)) if single_buffer_consts else {}

        def cspec(a):
            nd = a.ndim
            return pl.BlockSpec(a.shape, lambda b, nd=nd: (0,) * nd, **cmode)

        return pl.pallas_call(
            kern,
            out_shape=jax.ShapeDtypeStruct((B, D), jnp.float32),
            grid=(B // bt,),
            in_specs=data_specs + [cspec(a) for a in const_arrays],
            out_specs=pl.BlockSpec((bt, D), lambda b: (b, 0)),
            compiler_params=pltpu.CompilerParams(
                dimension_semantics=("parallel",),
                vmem_limit_bytes=vmem_limit),
        )(*data_arrays, *const_arrays)

    try:
        out = jax.block_until_ready(_run(True))
    except Exception:
        # Fallback if this JAX version rejects single-buffered constants (pl.Buffered(1)).
        out = _run(False)
    # nn.Dropout(dropout) is identity at inference.
    return out


# --------------------------------------------------------------------------
# Pure-JAX reference (mirrors the torch ops, with the same bf16 matmul rounding)
# --------------------------------------------------------------------------
def reference_forward(params, x, key, mask, value1, value2):
    H = params['heads']

    def qmm(a, w):  # bf16-rounded operands, f32 accumulation (matches the kernel's MXU dots)
        return jnp.matmul(a.astype(jnp.bfloat16).astype(jnp.float32),
                          w.astype(jnp.bfloat16).astype(jnp.float32))

    def proj(inp, p):
        w, b, g, be = p
        y = qmm(inp, w) + b
        y = jnp.where(y > 0, y, jnp.exp(jnp.minimum(y, 0.0)) - 1.0)
        n, d = y.shape
        dh = d // H
        yg = y.reshape(n, H, dh)
        mu = yg.mean(-1, keepdims=True)
        var = ((yg - mu) ** 2).mean(-1, keepdims=True)
        yn = (yg - mu) / jnp.sqrt(var + 1e-5)
        return yn.reshape(n, d) * g + be

    B, D = x.shape
    M = key.shape[1]
    dh = D // H
    q = proj(x, params['q']).reshape(B, H, dh)
    v1 = proj(value1, params['v1']).reshape(B, H, dh)
    k = proj(key.reshape(-1, D), params['k']).reshape(B, M, H, dh).transpose(0, 2, 1, 3)
    v2 = proj(value2.reshape(-1, D), params['v2']).reshape(B, M, H, dh).transpose(0, 2, 1, 3)

    sc = params['scatt']
    att_map = q[:, :, None, :] * k                                          # [B,H,M,dh]
    hid = jax.nn.relu(qmm(att_map, sc['w1']) + sc['b1'])                    # [B,H,M,MID]
    m_ext = mask[:, None, :, None]                                          # [B,1,M,1]
    pool = jnp.sum(hid * m_ext, axis=-2) / jnp.sum(m_ext, axis=-2)          # [B,H,MID]
    a_sp = (qmm(hid, sc['wl']) + sc['bl'])[..., 0]                          # [B,H,M]
    a_ch = jax.nn.sigmoid(qmm(pool, sc['wl2']) + sc['bl2'])                 # [B,H,dh]
    a_sp = jnp.where(mask[:, None, :] == 0, -1e9, a_sp)
    a_sp = jax.nn.softmax(a_sp, axis=-1)
    v2w = jnp.einsum('bhm,bhmd->bhd', a_sp, v2)
    return (v1 * v2w * a_ch).reshape(B, D)


# --------------------------------------------------------------------------
# Deterministic synthetic parameters
# --------------------------------------------------------------------------
def init_params(rng, D, H, MID):
    dh = D // H
    ks = iter(jax.random.split(rng, 32))

    def proj_params():
        w = 0.1 * jax.random.normal(next(ks), (D, D), jnp.float32)
        b = 0.1 * jax.random.normal(next(ks), (1, D), jnp.float32)
        g = 1.0 + 0.1 * jax.random.normal(next(ks), (1, D), jnp.float32)
        be = 0.1 * jax.random.normal(next(ks), (1, D), jnp.float32)
        return (w, b, g, be)

    scatt = {
        'w1': 0.2 * jax.random.normal(next(ks), (dh, MID), jnp.float32),
        'b1': 0.1 * jax.random.normal(next(ks), (1, MID), jnp.float32),
        'wl': 0.2 * jax.random.normal(next(ks), (MID, 1), jnp.float32),
        'bl': 0.1 * jax.random.normal(next(ks), (1, 1), jnp.float32),
        'wl2': 0.2 * jax.random.normal(next(ks), (MID, dh), jnp.float32),
        'bl2': 0.1 * jax.random.normal(next(ks), (1, dh), jnp.float32),
    }
    return {'heads': H, 'q': proj_params(), 'k': proj_params(),
            'v1': proj_params(), 'v2': proj_params(), 'scatt': scatt}


if __name__ == "__main__":
    # embed_dim=32, att_heads=4 (head_dim=8), att_mid_dim=[8,16,8], seq=8, batch=2
    B, M, D, H, MID = 2, 8, 32, 4, 16
    rng = jax.random.PRNGKey(0)
    r_x, r_k, r_p = jax.random.split(rng, 3)

    x = jax.random.normal(r_x, (B, D), jnp.float32)             # query / value1 (gv_feat)
    att_feats = jax.random.normal(r_k, (B, M, D), jnp.float32)  # key / value2
    mask = jnp.ones((B, M), jnp.float32).at[1, 6:].set(0.0)     # pad last 2 positions of batch 1

    params = init_params(r_p, D, H, MID)
    consts = prepare_constants(params)                          # hoisted: once per model

    out = lowrank_bilinear_layer(params, x, key=att_feats, mask=mask,
                                 value1=x, value2=att_feats, consts=consts)
    out = jax.block_until_ready(out)

    ref = reference_forward(params, x, att_feats, mask, x, att_feats)
    assert out.shape == (B, D)
    assert jnp.allclose(out, ref, atol=1e-2, rtol=1e-2), float(jnp.max(jnp.abs(out - ref)))
    print("KERNEL_OK")
</pallas_src>

<mosaic_0001>
module attributes {stable_mosaic.version = 11 : i64} {
  func.func @_lrb_kernel(%arg0: i32, %arg1: memref<2x32xbf16, #tpu.memory_space<vmem>>, %arg2: memref<2x8x32xbf16, #tpu.memory_space<vmem>>, %arg3: memref<2x8xf32, #tpu.memory_space<vmem>>, %arg4: memref<32x64xbf16, #tpu.memory_space<vmem>>, %arg5: memref<3x64xf32, #tpu.memory_space<vmem>>, %arg6: memref<32x64xbf16, #tpu.memory_space<vmem>>, %arg7: memref<3x64xf32, #tpu.memory_space<vmem>>, %arg8: memref<64x8xf32, #tpu.memory_space<vmem>>, %arg9: memref<8x64xf32, #tpu.memory_space<vmem>>, %arg10: memref<32x64xbf16, #tpu.memory_space<vmem>>, %arg11: memref<1x64xf32, #tpu.memory_space<vmem>>, %arg12: memref<64x4xbf16, #tpu.memory_space<vmem>>, %arg13: memref<1x4xf32, #tpu.memory_space<vmem>>, %arg14: memref<64x32xbf16, #tpu.memory_space<vmem>>, %arg15: memref<1x32xf32, #tpu.memory_space<vmem>>, %arg16: memref<2x32xf32, #tpu.memory_space<vmem>>) attributes {dimension_semantics = [#tpu.dimension_semantics<parallel>], iteration_bounds = array<i64: 1>, scalar_prefetch = 0 : i64, scratch_operands = 0 : i64, tpu.core_type = #tpu.core_type<tc>, window_params = [{transform_indices = @transform_0, window_bounds = array<i64: 2, 32>}, {transform_indices = @transform_1, window_bounds = array<i64: 2, 8, 32>}, {transform_indices = @transform_2, window_bounds = array<i64: 2, 8>}, {pipeline_mode = #tpu.pipeline_mode<synchronous>, transform_indices = @transform_3, window_bounds = array<i64: 32, 64>}, {pipeline_mode = #tpu.pipeline_mode<synchronous>, transform_indices = @transform_4, window_bounds = array<i64: 3, 64>}, {pipeline_mode = #tpu.pipeline_mode<synchronous>, transform_indices = @transform_5, window_bounds = array<i64: 32, 64>}, {pipeline_mode = #tpu.pipeline_mode<synchronous>, transform_indices = @transform_6, window_bounds = array<i64: 3, 64>}, {pipeline_mode = #tpu.pipeline_mode<synchronous>, transform_indices = @transform_7, window_bounds = array<i64: 64, 8>}, {pipeline_mode = #tpu.pipeline_mode<synchronous>, transform_indices = @transform_8, window_bounds = array<i64: 8, 64>}, {pipeline_mode = #tpu.pipeline_mode<synchronous>, transform_indices = @transform_9, window_bounds = array<i64: 32, 64>}, {pipeline_mode = #tpu.pipeline_mode<synchronous>, transform_indices = @transform_10, window_bounds = array<i64: 1, 64>}, {pipeline_mode = #tpu.pipeline_mode<synchronous>, transform_indices = @transform_11, window_bounds = array<i64: 64, 4>}, {pipeline_mode = #tpu.pipeline_mode<synchronous>, transform_indices = @transform_12, window_bounds = array<i64: 1, 4>}, {pipeline_mode = #tpu.pipeline_mode<synchronous>, transform_indices = @transform_13, window_bounds = array<i64: 64, 32>}, {pipeline_mode = #tpu.pipeline_mode<synchronous>, transform_indices = @transform_14, window_bounds = array<i64: 1, 32>}, {transform_indices = @transform_15, window_bounds = array<i64: 2, 32>}]} {
    %c0 = arith.constant 0 : index
    %c0_0 = arith.constant 0 : index
    %0 = vector.load %arg8[%c0, %c0_0] : memref<64x8xf32, #tpu.memory_space<vmem>>, vector<64x8xf32>
    %c0_1 = arith.constant 0 : index
    %c0_2 = arith.constant 0 : index
    %1 = vector.load %arg9[%c0_1, %c0_2] : memref<8x64xf32, #tpu.memory_space<vmem>>, vector<8x64xf32>
    %2 = vector.extract_strided_slice %1 {offsets = [0, 0], sizes = [4, 32], strides = [1, 1]} : vector<8x64xf32> to vector<4x32xf32>
    %c0_3 = arith.constant 0 : index
    %c0_4 = arith.constant 0 : index
    %3 = vector.load %arg1[%c0_3, %c0_4] : memref<2x32xbf16, #tpu.memory_space<vmem>>, vector<2x32xbf16>
    %c0_5 = arith.constant 0 : index
    %c0_6 = arith.constant 0 : index
    %4 = vector.load %arg4[%c0_5, %c0_6] : memref<32x64xbf16, #tpu.memory_space<vmem>>, vector<32x64xbf16>
    %c0_7 = arith.constant 0 : index
    %c0_8 = arith.constant 0 : index
    %5 = vector.load %arg5[%c0_7, %c0_8] : memref<3x64xf32, #tpu.memory_space<vmem>>, vector<3x64xf32>
    %cst = arith.constant dense<0.000000e+00> : vector<2x64xf32>
    %6 = tpu.matmul %3, %4, %cst {dimension_numbers = #tpu.dot_dimension_numbers<[1], [0], [0], [1], [0, 0, 1, 1], [], []>} : vector<2x32xbf16>, vector<32x64xbf16>, vector<2x64xf32> -> vector<2x64xf32>
    %7 = vector.extract_strided_slice %5 {offsets = [0, 0], sizes = [1, 64], strides = [1, 1]} : vector<3x64xf32> to vector<1x64xf32>
    %8 = vector.broadcast %7 : vector<1x64xf32> to vector<2x64xf32>
    %9 = arith.addf %6, %8 : vector<2x64xf32>
    %cst_9 = arith.constant 0.000000e+00 : f32
    %10 = vector.broadcast %cst_9 : f32 to vector<2x64xf32>
    %11 = arith.cmpf ogt, %9, %10 : vector<2x64xf32>
    %cst_10 = arith.constant 0.000000e+00 : f32
    %12 = vector.broadcast %cst_10 : f32 to vector<2x64xf32>
    %13 = arith.minimumf %9, %12 : vector<2x64xf32>
    %14 = math.exp %13 : vector<2x64xf32>
    %cst_11 = arith.constant 1.000000e+00 : f32
    %15 = vector.broadcast %cst_11 : f32 to vector<2x64xf32>
    %16 = arith.subf %14, %15 : vector<2x64xf32>
    %17 = arith.select %11, %9, %16 : vector<2x64xi1>, vector<2x64xf32>
    %cst_12 = arith.constant dense<0.000000e+00> : vector<2x8xf32>
    %18 = tpu.matmul %17, %0, %cst_12 {dimension_numbers = #tpu.dot_dimension_numbers<[1], [0], [0], [1], [0, 0, 1, 1], [], []>} : vector<2x64xf32>, vector<64x8xf32>, vector<2x8xf32> -> vector<2x8xf32>
    %cst_13 = arith.constant 1.250000e-01 : f32
    %19 = vector.broadcast %cst_13 : f32 to vector<2x8xf32>
    %20 = arith.mulf %18, %19 : vector<2x8xf32>
    %cst_14 = arith.constant dense<0.000000e+00> : vector<2x64xf32>
    %21 = tpu.matmul %20, %1, %cst_14 {dimension_numbers = #tpu.dot_dimension_numbers<[1], [0], [0], [1], [0, 0, 1, 1], [], []>} : vector<2x8xf32>, vector<8x64xf32>, vector<2x64xf32> -> vector<2x64xf32>
    %22 = arith.subf %17, %21 : vector<2x64xf32>
    %23 = arith.mulf %22, %22 : vector<2x64xf32>
    %cst_15 = arith.constant dense<0.000000e+00> : vector<2x8xf32>
    %24 = tpu.matmul %23, %0, %cst_15 {dimension_numbers = #tpu.dot_dimension_numbers<[1], [0], [0], [1], [0, 0, 1, 1], [], []>} : vector<2x64xf32>, vector<64x8xf32>, vector<2x8xf32> -> vector<2x8xf32>
    %cst_16 = arith.constant 1.250000e-01 : f32
    %25 = vector.broadcast %cst_16 : f32 to vector<2x8xf32>
    %26 = arith.mulf %24, %25 : vector<2x8xf32>
    %cst_17 = arith.constant 9.99999974E-6 : f32
    %27 = vector.broadcast %cst_17 : f32 to vector<2x8xf32>
    %28 = arith.addf %26, %27 : vector<2x8xf32>
    %29 = math.rsqrt %28 : vector<2x8xf32>
    %cst_18 = arith.constant dense<0.000000e+00> : vector<2x64xf32>
    %30 = tpu.matmul %29, %1, %cst_18 {dimension_numbers = #tpu.dot_dimension_numbers<[1], [0], [0], [1], [0, 0, 1, 1], [], []>} : vector<2x8xf32>, vector<8x64xf32>, vector<2x64xf32> -> vector<2x64xf32>
    %31 = arith.mulf %22, %30 : vector<2x64xf32>
    %32 = vector.extract_strided_slice %5 {offsets = [1, 0], sizes = [1, 64], strides = [1, 1]} : vector<3x64xf32> to vector<1x64xf32>
    %33 = vector.broadcast %32 : vector<1x64xf32> to vector<2x64xf32>
    %34 = arith.mulf %31, %33 : vector<2x64xf32>
    %35 = vector.extract_strided_slice %5 {offsets = [2, 0], sizes = [1, 64], strides = [1, 1]} : vector<3x64xf32> to vector<1x64xf32>
    %36 = vector.broadcast %35 : vector<1x64xf32> to vector<2x64xf32>
    %37 = arith.addf %34, %36 : vector<2x64xf32>
    %38 = vector.extract_strided_slice %37 {offsets = [0, 0], sizes = [2, 32], strides = [1, 1]} : vector<2x64xf32> to vector<2x32xf32>
    %39 = vector.extract_strided_slice %37 {offsets = [0, 32], sizes = [2, 32], strides = [1, 1]} : vector<2x64xf32> to vector<2x32xf32>
    %c0_19 = arith.constant 0 : index
    %c0_20 = arith.constant 0 : index
    %c0_21 = arith.constant 0 : index
    %40 = vector.load %arg2[%c0_19, %c0_20, %c0_21] : memref<2x8x32xbf16, #tpu.memory_space<vmem>>, vector<2x8x32xbf16>
    %41 = vector.shape_cast %40 : vector<2x8x32xbf16> to vector<16x32xbf16>
    %c0_22 = arith.constant 0 : index
    %c0_23 = arith.constant 0 : index
    %42 = vector.load %arg6[%c0_22, %c0_23] : memref<32x64xbf16, #tpu.memory_space<vmem>>, vector<32x64xbf16>
    %c0_24 = arith.constant 0 : index
    %c0_25 = arith.constant 0 : index
    %43 = vector.load %arg7[%c0_24, %c0_25] : memref<3x64xf32, #tpu.memory_space<vmem>>, vector<3x64xf32>
    %cst_26 = arith.constant dense<0.000000e+00> : vector<16x64xf32>
    %44 = tpu.matmul %41, %42, %cst_26 {dimension_numbers = #tpu.dot_dimension_numbers<[1], [0], [0], [1], [0, 0, 1, 1], [], []>} : vector<16x32xbf16>, vector<32x64xbf16>, vector<16x64xf32> -> vector<16x64xf32>
    %45 = vector.extract_strided_slice %43 {offsets = [0, 0], sizes = [1, 64], strides = [1, 1]} : vector<3x64xf32> to vector<1x64xf32>
    %46 = vector.broadcast %45 : vector<1x64xf32> to vector<16x64xf32>
    %47 = arith.addf %44, %46 : vector<16x64xf32>
    %cst_27 = arith.constant 0.000000e+00 : f32
    %48 = vector.broadcast %cst_27 : f32 to vector<16x64xf32>
    %49 = arith.cmpf ogt, %47, %48 : vector<16x64xf32>
    %cst_28 = arith.constant 0.000000e+00 : f32
    %50 = vector.broadcast %cst_28 : f32 to vector<16x64xf32>
    %51 = arith.minimumf %47, %50 : vector<16x64xf32>
    %52 = math.exp %51 : vector<16x64xf32>
    %cst_29 = arith.constant 1.000000e+00 : f32
    %53 = vector.broadcast %cst_29 : f32 to vector<16x64xf32>
    %54 = arith.subf %52, %53 : vector<16x64xf32>
    %55 = arith.select %49, %47, %54 : vector<16x64xi1>, vector<16x64xf32>
    %cst_30 = arith.constant dense<0.000000e+00> : vector<16x8xf32>
    %56 = tpu.matmul %55, %0, %cst_30 {dimension_numbers = #tpu.dot_dimension_numbers<[1], [0], [0], [1], [0, 0, 1, 1], [], []>} : vector<16x64xf32>, vector<64x8xf32>, vector<16x8xf32> -> vector<16x8xf32>
    %cst_31 = arith.constant 1.250000e-01 : f32
    %57 = vector.broadcast %cst_31 : f32 to vector<16x8xf32>
    %58 = arith.mulf %56, %57 : vector<16x8xf32>
    %cst_32 = arith.constant dense<0.000000e+00> : vector<16x64xf32>
    %59 = tpu.matmul %58, %1, %cst_32 {dimension_numbers = #tpu.dot_dimension_numbers<[1], [0], [0], [1], [0, 0, 1, 1], [], []>} : vector<16x8xf32>, vector<8x64xf32>, vector<16x64xf32> -> vector<16x64xf32>
    %60 = arith.subf %55, %59 : vector<16x64xf32>
    %61 = arith.mulf %60, %60 : vector<16x64xf32>
    %cst_33 = arith.constant dense<0.000000e+00> : vector<16x8xf32>
    %62 = tpu.matmul %61, %0, %cst_33 {dimension_numbers = #tpu.dot_dimension_numbers<[1], [0], [0], [1], [0, 0, 1, 1], [], []>} : vector<16x64xf32>, vector<64x8xf32>, vector<16x8xf32> -> vector<16x8xf32>
    %cst_34 = arith.constant 1.250000e-01 : f32
    %63 = vector.broadcast %cst_34 : f32 to vector<16x8xf32>
    %64 = arith.mulf %62, %63 : vector<16x8xf32>
    %cst_35 = arith.constant 9.99999974E-6 : f32
    %65 = vector.broadcast %cst_35 : f32 to vector<16x8xf32>
    %66 = arith.addf %64, %65 : vector<16x8xf32>
    %67 = math.rsqrt %66 : vector<16x8xf32>
    %cst_36 = arith.constant dense<0.000000e+00> : vector<16x64xf32>
    %68 = tpu.matmul %67, %1, %cst_36 {dimension_numbers = #tpu.dot_dimension_numbers<[1], [0], [0], [1], [0, 0, 1, 1], [], []>} : vector<16x8xf32>, vector<8x64xf32>, vector<16x64xf32> -> vector<16x64xf32>
    %69 = arith.mulf %60, %68 : vector<16x64xf32>
    %70 = vector.extract_strided_slice %43 {offsets = [1, 0], sizes = [1, 64], strides = [1, 1]} : vector<3x64xf32> to vector<1x64xf32>
    %71 = vector.broadcast %70 : vector<1x64xf32> to vector<16x64xf32>
    %72 = arith.mulf %69, %71 : vector<16x64xf32>
    %73 = vector.extract_strided_slice %43 {offsets = [2, 0], sizes = [1, 64], strides = [1, 1]} : vector<3x64xf32> to vector<1x64xf32>
    %74 = vector.broadcast %73 : vector<1x64xf32> to vector<16x64xf32>
    %75 = arith.addf %72, %74 : vector<16x64xf32>
    %76 = vector.extract_strided_slice %75 {offsets = [0, 0], sizes = [16, 32], strides = [1, 1]} : vector<16x64xf32> to vector<16x32xf32>
    %77 = vector.extract_strided_slice %75 {offsets = [0, 32], sizes = [16, 32], strides = [1, 1]} : vector<16x64xf32> to vector<16x32xf32>
    %78 = vector.shape_cast %38 : vector<2x32xf32> to vector<2x1x32xf32>
    %79 = vector.shape_cast %76 : vector<16x32xf32> to vector<2x8x32xf32>
    %80 = vector.broadcast %78 : vector<2x1x32xf32> to vector<2x8x32xf32>
    %81 = arith.mulf %80, %79 : vector<2x8x32xf32>
    %82 = vector.shape_cast %81 : vector<2x8x32xf32> to vector<16x32xf32>
    %83 = arith.truncf %82 : vector<16x32xf32> to vector<16x32xbf16>
    %c0_37 = arith.constant 0 : index
    %c0_38 = arith.constant 0 : index
    %84 = vector.load %arg10[%c0_37, %c0_38] : memref<32x64xbf16, #tpu.memory_space<vmem>>, vector<32x64xbf16>
    %cst_39 = arith.constant dense<0.000000e+00> : vector<16x64xf32>
    %85 = tpu.matmul %83, %84, %cst_39 {dimension_numbers = #tpu.dot_dimension_numbers<[1], [0], [0], [1], [0, 0, 1, 1], [], []>} : vector<16x32xbf16>, vector<32x64xbf16>, vector<16x64xf32> -> vector<16x64xf32>
    %c0_40 = arith.constant 0 : index
    %c0_41 = arith.constant 0 : index
    %86 = vector.load %arg11[%c0_40, %c0_41] : memref<1x64xf32, #tpu.memory_space<vmem>>, vector<1x64xf32>
    %87 = vector.broadcast %86 : vector<1x64xf32> to vector<16x64xf32>
    %88 = arith.addf %85, %87 : vector<16x64xf32>
    %cst_42 = arith.constant 0.000000e+00 : f32
    %89 = vector.broadcast %cst_42 : f32 to vector<16x64xf32>
    %90 = arith.maximumf %88, %89 : vector<16x64xf32>
    %c0_43 = arith.constant 0 : index
    %c0_44 = arith.constant 0 : index
    %91 = vector.load %arg3[%c0_43, %c0_44] : memref<2x8xf32, #tpu.memory_space<vmem>>, vector<2x8xf32>
    %92 = vector.shape_cast %91 : vector<2x8xf32> to vector<2x8x1xf32>
    %93 = arith.truncf %90 : vector<16x64xf32> to vector<16x64xbf16>
    %c0_45 = arith.constant 0 : index
    %c0_46 = arith.constant 0 : index
    %94 = vector.load %arg12[%c0_45, %c0_46] : memref<64x4xbf16, #tpu.memory_space<vmem>>, vector<64x4xbf16>
    %cst_47 = arith.constant dense<0.000000e+00> : vector<16x4xf32>
    %95 = tpu.matmul %93, %94, %cst_47 {dimension_numbers = #tpu.dot_dimension_numbers<[1], [0], [0], [1], [0, 0, 1, 1], [], []>} : vector<16x64xbf16>, vector<64x4xbf16>, vector<16x4xf32> -> vector<16x4xf32>
    %c0_48 = arith.constant 0 : index
    %c0_49 = arith.constant 0 : index
    %96 = vector.load %arg13[%c0_48, %c0_49] : memref<1x4xf32, #tpu.memory_space<vmem>>, vector<1x4xf32>
    %97 = vector.broadcast %96 : vector<1x4xf32> to vector<16x4xf32>
    %98 = arith.addf %95, %97 : vector<16x4xf32>
    %99 = vector.shape_cast %98 : vector<16x4xf32> to vector<2x8x4xf32>
    %cst_50 = arith.constant 0.000000e+00 : f32
    %100 = vector.broadcast %cst_50 : f32 to vector<2x8x1xf32>
    %101 = arith.cmpf oeq, %92, %100 : vector<2x8x1xf32>
    %cst_51 = arith.constant -1.000000e+09 : f32
    %102 = vector.shape_cast %101 : vector<2x8x1xi1> to vector<2x8x1xi1>
    %103 = vector.broadcast %102 : vector<2x8x1xi1> to vector<2x8x4xi1>
    %104 = vector.broadcast %cst_51 : f32 to vector<2x8x4xf32>
    %105 = arith.select %103, %104, %99 : vector<2x8x4xi1>, vector<2x8x4xf32>
    %cst_52 = arith.constant dense<0xFF800000> : vector<2x4xf32>
    %106 = vector.multi_reduction <maximumf>, %105, %cst_52 [1] : vector<2x8x4xf32> to vector<2x4xf32>
    %107 = vector.shape_cast %106 : vector<2x4xf32> to vector<2x1x4xf32>
    %108 = vector.broadcast %107 : vector<2x1x4xf32> to vector<2x8x4xf32>
    %109 = arith.subf %105, %108 : vector<2x8x4xf32>
    %110 = math.exp %109 : vector<2x8x4xf32>
    %cst_53 = arith.constant dense<0.000000e+00> : vector<2x4xf32>
    %111 = vector.multi_reduction <add>, %110, %cst_53 [1] : vector<2x8x4xf32> to vector<2x4xf32>
    %112 = vector.shape_cast %111 : vector<2x4xf32> to vector<2x1x4xf32>
    %113 = vector.broadcast %112 : vector<2x1x4xf32> to vector<2x8x4xf32>
    %114 = arith.divf %110, %113 : vector<2x8x4xf32>
    %cst_54 = arith.constant dense<0.000000e+00> : vector<2xf32>
    %115 = vector.multi_reduction <add>, %91, %cst_54 [1] : vector<2x8xf32> to vector<2xf32>
    %116 = vector.shape_cast %115 : vector<2xf32> to vector<2x1xf32>
    %117 = vector.shape_cast %90 : vector<16x64xf32> to vector<2x8x64xf32>
    %118 = vector.broadcast %92 : vector<2x8x1xf32> to vector<2x8x64xf32>
    %119 = arith.mulf %117, %118 : vector<2x8x64xf32>
    %cst_55 = arith.constant dense<0.000000e+00> : vector<2x64xf32>
    %120 = vector.multi_reduction <add>, %119, %cst_55 [1] : vector<2x8x64xf32> to vector<2x64xf32>
    %121 = vector.broadcast %116 : vector<2x1xf32> to vector<2x64xf32>
    %122 = arith.divf %120, %121 : vector<2x64xf32>
    %123 = arith.truncf %122 : vector<2x64xf32> to vector<2x64xbf16>
    %c0_56 = arith.constant 0 : index
    %c0_57 = arith.constant 0 : index
    %124 = vector.load %arg14[%c0_56, %c0_57] : memref<64x32xbf16, #tpu.memory_space<vmem>>, vector<64x32xbf16>
    %cst_58 = arith.constant dense<0.000000e+00> : vector<2x32xf32>
    %125 = tpu.matmul %123, %124, %cst_58 {dimension_numbers = #tpu.dot_dimension_numbers<[1], [0], [0], [1], [0, 0, 1, 1], [], []>} : vector<2x64xbf16>, vector<64x32xbf16>, vector<2x32xf32> -> vector<2x32xf32>
    %c0_59 = arith.constant 0 : index
    %c0_60 = arith.constant 0 : index
    %126 = vector.load %arg15[%c0_59, %c0_60] : memref<1x32xf32, #tpu.memory_space<vmem>>, vector<1x32xf32>
    %127 = vector.broadcast %126 : vector<1x32xf32> to vector<2x32xf32>
    %128 = arith.addf %125, %127 : vector<2x32xf32>
    %129 = arith.negf %128 : vector<2x32xf32>
    %130 = math.exp %129 : vector<2x32xf32>
    %cst_61 = arith.constant 1.000000e+00 : f32
    %131 = vector.broadcast %cst_61 : f32 to vector<2x32xf32>
    %132 = arith.addf %131, %130 : vector<2x32xf32>
    %133 = arith.divf %131, %132 : vector<2x32xf32>
    %134 = vector.shape_cast %114 : vector<2x8x4xf32> to vector<16x4xf32>
    %cst_62 = arith.constant dense<0.000000e+00> : vector<16x32xf32>
    %135 = tpu.matmul %134, %2, %cst_62 {dimension_numbers = #tpu.dot_dimension_numbers<[1], [0], [0], [1], [0, 0, 1, 1], [], []>} : vector<16x4xf32>, vector<4x32xf32>, vector<16x32xf32> -> vector<16x32xf32>
    %136 = arith.mulf %135, %77 : vector<16x32xf32>
    %137 = vector.shape_cast %136 : vector<16x32xf32> to vector<2x8x32xf32>
    %cst_63 = arith.constant dense<0.000000e+00> : vector<2x32xf32>
    %138 = vector.multi_reduction <add>, %137, %cst_63 [1] : vector<2x8x32xf32> to vector<2x32xf32>
    %139 = arith.mulf %39, %138 : vector<2x32xf32>
    %140 = arith.mulf %139, %133 : vector<2x32xf32>
    %c0_64 = arith.constant 0 : index
    %c0_65 = arith.constant 0 : index
    %141 = vector.load %arg16[%c0_64, %c0_65] : memref<2x32xf32, #tpu.memory_space<vmem>>, vector<2x32xf32>
    tpu.vector_store %arg16[%c0_64, %c0_65], %140 {strides = array<i32>} : memref<2x32xf32, #tpu.memory_space<vmem>>, vector<2x32xf32>,
    return
  }
  func.func @transform_0(%arg0: i32) -> (i32, i32) {
    %c0_i32 = arith.constant 0 : i32
    %c0_i32_0 = arith.constant 0 : i32
    return %arg0, %c0_i32 : i32, i32
  }
  func.func @transform_1(%arg0: i32) -> (i32, i32, i32) {
    %c0_i32 = arith.constant 0 : i32
    %c0_i32_0 = arith.constant 0 : i32
    %c0_i32_1 = arith.constant 0 : i32
    return %arg0, %c0_i32, %c0_i32_0 : i32, i32, i32
  }
  func.func @transform_2(%arg0: i32) -> (i32, i32) {
    %c0_i32 = arith.constant 0 : i32
    %c0_i32_0 = arith.constant 0 : i32
    return %arg0, %c0_i32 : i32, i32
  }
  func.func @transform_3(%arg0: i32) -> (i32, i32) {
    %c0_i32 = arith.constant 0 : i32
    %c0_i32_0 = arith.constant 0 : i32
    %c0_i32_1 = arith.constant 0 : i32
    return %c0_i32, %c0_i32_0 : i32, i32
  }
  func.func @transform_4(%arg0: i32) -> (i32, i32) {
    %c0_i32 = arith.constant 0 : i32
    %c0_i32_0 = arith.constant 0 : i32
    %c0_i32_1 = arith.constant 0 : i32
    return %c0_i32, %c0_i32_0 : i32, i32
  }
  func.func @transform_5(%arg0: i32) -> (i32, i32) {
    %c0_i32 = arith.constant 0 : i32
    %c0_i32_0 = arith.constant 0 : i32
    %c0_i32_1 = arith.constant 0 : i32
    return %c0_i32, %c0_i32_0 : i32, i32
  }
  func.func @transform_6(%arg0: i32) -> (i32, i32) {
    %c0_i32 = arith.constant 0 : i32
    %c0_i32_0 = arith.constant 0 : i32
    %c0_i32_1 = arith.constant 0 : i32
    return %c0_i32, %c0_i32_0 : i32, i32
  }
  func.func @transform_7(%arg0: i32) -> (i32, i32) {
    %c0_i32 = arith.constant 0 : i32
    %c0_i32_0 = arith.constant 0 : i32
    %c0_i32_1 = arith.constant 0 : i32
    return %c0_i32, %c0_i32_0 : i32, i32
  }
  func.func @transform_8(%arg0: i32) -> (i32, i32) {
    %c0_i32 = arith.constant 0 : i32
    %c0_i32_0 = arith.constant 0 : i32
    %c0_i32_1 = arith.constant 0 : i32
    return %c0_i32, %c0_i32_0 : i32, i32
  }
  func.func @transform_9(%arg0: i32) -> (i32, i32) {
    %c0_i32 = arith.constant 0 : i32
    %c0_i32_0 = arith.constant 0 : i32
    %c0_i32_1 = arith.constant 0 : i32
    return %c0_i32, %c0_i32_0 : i32, i32
  }
  func.func @transform_10(%arg0: i32) -> (i32, i32) {
    %c0_i32 = arith.constant 0 : i32
    %c0_i32_0 = arith.constant 0 : i32
    %c0_i32_1 = arith.constant 0 : i32
    return %c0_i32, %c0_i32_0 : i32, i32
  }
  func.func @transform_11(%arg0: i32) -> (i32, i32) {
    %c0_i32 = arith.constant 0 : i32
    %c0_i32_0 = arith.constant 0 : i32
    %c0_i32_1 = arith.constant 0 : i32
    return %c0_i32, %c0_i32_0 : i32, i32
  }
  func.func @transform_12(%arg0: i32) -> (i32, i32) {
    %c0_i32 = arith.constant 0 : i32
    %c0_i32_0 = arith.constant 0 : i32
    %c0_i32_1 = arith.constant 0 : i32
    return %c0_i32, %c0_i32_0 : i32, i32
  }
  func.func @transform_13(%arg0: i32) -> (i32, i32) {
    %c0_i32 = arith.constant 0 : i32
    %c0_i32_0 = arith.constant 0 : i32
    %c0_i32_1 = arith.constant 0 : i32
    return %c0_i32, %c0_i32_0 : i32, i32
  }
  func.func @transform_14(%arg0: i32) -> (i32, i32) {
    %c0_i32 = arith.constant 0 : i32
    %c0_i32_0 = arith.constant 0 : i32
    %c0_i32_1 = arith.constant 0 : i32
    return %c0_i32, %c0_i32_0 : i32, i32
  }
  func.func @transform_15(%arg0: i32) -> (i32, i32) {
    %c0_i32 = arith.constant 0 : i32
    %c0_i32_0 = arith.constant 0 : i32
    return %arg0, %c0_i32 : i32, i32
  }
}

module attributes {stable_mosaic.version = 11 : i64} {
  func.func @_lrb_kernel(%arg0: i32, %arg1: memref<2x32xbf16, #tpu.memory_space<vmem>>, %arg2: memref<2x8x32xbf16, #tpu.memory_space<vmem>>, %arg3: memref<2x8xf32, #tpu.memory_space<vmem>>, %arg4: memref<32x64xbf16, #tpu.memory_space<vmem>>, %arg5: memref<3x64xf32, #tpu.memory_space<vmem>>, %arg6: memref<32x64xbf16, #tpu.memory_space<vmem>>, %arg7: memref<3x64xf32, #tpu.memory_space<vmem>>, %arg8: memref<64x8xf32, #tpu.memory_space<vmem>>, %arg9: memref<8x64xf32, #tpu.memory_space<vmem>>, %arg10: memref<32x64xbf16, #tpu.memory_space<vmem>>, %arg11: memref<1x64xf32, #tpu.memory_space<vmem>>, %arg12: memref<64x4xbf16, #tpu.memory_space<vmem>>, %arg13: memref<1x4xf32, #tpu.memory_space<vmem>>, %arg14: memref<64x32xbf16, #tpu.memory_space<vmem>>, %arg15: memref<1x32xf32, #tpu.memory_space<vmem>>, %arg16: memref<2x32xf32, #tpu.memory_space<vmem>>) attributes {dimension_semantics = [#tpu.dimension_semantics<parallel>], iteration_bounds = array<i64: 1>, scalar_prefetch = 0 : i64, scratch_operands = 0 : i64, tpu.core_type = #tpu.core_type<tc>, window_params = [{transform_indices = @transform_0, window_bounds = array<i64: 2, 32>}, {transform_indices = @transform_1, window_bounds = array<i64: 2, 8, 32>}, {transform_indices = @transform_2, window_bounds = array<i64: 2, 8>}, {pipeline_mode = #tpu.pipeline_mode<synchronous>, transform_indices = @transform_3, window_bounds = array<i64: 32, 64>}, {pipeline_mode = #tpu.pipeline_mode<synchronous>, transform_indices = @transform_4, window_bounds = array<i64: 3, 64>}, {pipeline_mode = #tpu.pipeline_mode<synchronous>, transform_indices = @transform_5, window_bounds = array<i64: 32, 64>}, {pipeline_mode = #tpu.pipeline_mode<synchronous>, transform_indices = @transform_6, window_bounds = array<i64: 3, 64>}, {pipeline_mode = #tpu.pipeline_mode<synchronous>, transform_indices = @transform_7, window_bounds = array<i64: 64, 8>}, {pipeline_mode = #tpu.pipeline_mode<synchronous>, transform_indices = @transform_8, window_bounds = array<i64: 8, 64>}, {pipeline_mode = #tpu.pipeline_mode<synchronous>, transform_indices = @transform_9, window_bounds = array<i64: 32, 64>}, {pipeline_mode = #tpu.pipeline_mode<synchronous>, transform_indices = @transform_10, window_bounds = array<i64: 1, 64>}, {pipeline_mode = #tpu.pipeline_mode<synchronous>, transform_indices = @transform_11, window_bounds = array<i64: 64, 4>}, {pipeline_mode = #tpu.pipeline_mode<synchronous>, transform_indices = @transform_12, window_bounds = array<i64: 1, 4>}, {pipeline_mode = #tpu.pipeline_mode<synchronous>, transform_indices = @transform_13, window_bounds = array<i64: 64, 32>}, {pipeline_mode = #tpu.pipeline_mode<synchronous>, transform_indices = @transform_14, window_bounds = array<i64: 1, 32>}, {transform_indices = @transform_15, window_bounds = array<i64: 2, 32>}]} {
    %c0 = arith.constant 0 : index
    %c0_0 = arith.constant 0 : index
    %0 = vector.load %arg8[%c0, %c0_0] : memref<64x8xf32, #tpu.memory_space<vmem>>, vector<64x8xf32>
    %c0_1 = arith.constant 0 : index
    %c0_2 = arith.constant 0 : index
    %1 = vector.load %arg9[%c0_1, %c0_2] : memref<8x64xf32, #tpu.memory_space<vmem>>, vector<8x64xf32>
    %2 = vector.extract_strided_slice %1 {offsets = [0, 0], sizes = [4, 32], strides = [1, 1]} : vector<8x64xf32> to vector<4x32xf32>
    %c0_3 = arith.constant 0 : index
    %c0_4 = arith.constant 0 : index
    %3 = vector.load %arg1[%c0_3, %c0_4] : memref<2x32xbf16, #tpu.memory_space<vmem>>, vector<2x32xbf16>
    %c0_5 = arith.constant 0 : index
    %c0_6 = arith.constant 0 : index
    %4 = vector.load %arg4[%c0_5, %c0_6] : memref<32x64xbf16, #tpu.memory_space<vmem>>, vector<32x64xbf16>
    %c0_7 = arith.constant 0 : index
    %c0_8 = arith.constant 0 : index
    %5 = vector.load %arg5[%c0_7, %c0_8] : memref<3x64xf32, #tpu.memory_space<vmem>>, vector<3x64xf32>
    %cst = arith.constant dense<0.000000e+00> : vector<2x64xf32>
    %6 = tpu.matmul %3, %4, %cst {dimension_numbers = #tpu.dot_dimension_numbers<[1], [0], [0], [1], [0, 0, 1, 1], [], []>} : vector<2x32xbf16>, vector<32x64xbf16>, vector<2x64xf32> -> vector<2x64xf32>
    %7 = vector.extract_strided_slice %5 {offsets = [0, 0], sizes = [1, 64], strides = [1, 1]} : vector<3x64xf32> to vector<1x64xf32>
    %8 = vector.broadcast %7 : vector<1x64xf32> to vector<2x64xf32>
    %9 = arith.addf %6, %8 : vector<2x64xf32>
    %cst_9 = arith.constant 0.000000e+00 : f32
    %10 = vector.broadcast %cst_9 : f32 to vector<2x64xf32>
    %11 = arith.cmpf ogt, %9, %10 : vector<2x64xf32>
    %cst_10 = arith.constant 0.000000e+00 : f32
    %12 = vector.broadcast %cst_10 : f32 to vector<2x64xf32>
    %13 = arith.minimumf %9, %12 : vector<2x64xf32>
    %14 = math.exp %13 : vector<2x64xf32>
    %cst_11 = arith.constant 1.000000e+00 : f32
    %15 = vector.broadcast %cst_11 : f32 to vector<2x64xf32>
    %16 = arith.subf %14, %15 : vector<2x64xf32>
    %17 = arith.select %11, %9, %16 : vector<2x64xi1>, vector<2x64xf32>
    %cst_12 = arith.constant dense<0.000000e+00> : vector<2x8xf32>
    %18 = tpu.matmul %17, %0, %cst_12 {dimension_numbers = #tpu.dot_dimension_numbers<[1], [0], [0], [1], [0, 0, 1, 1], [], []>} : vector<2x64xf32>, vector<64x8xf32>, vector<2x8xf32> -> vector<2x8xf32>
    %cst_13 = arith.constant 1.250000e-01 : f32
    %19 = vector.broadcast %cst_13 : f32 to vector<2x8xf32>
    %20 = arith.mulf %18, %19 : vector<2x8xf32>
    %cst_14 = arith.constant dense<0.000000e+00> : vector<2x64xf32>
    %21 = tpu.matmul %20, %1, %cst_14 {dimension_numbers = #tpu.dot_dimension_numbers<[1], [0], [0], [1], [0, 0, 1, 1], [], []>} : vector<2x8xf32>, vector<8x64xf32>, vector<2x64xf32> -> vector<2x64xf32>
    %22 = arith.subf %17, %21 : vector<2x64xf32>
    %23 = arith.mulf %22, %22 : vector<2x64xf32>
    %cst_15 = arith.constant dense<0.000000e+00> : vector<2x8xf32>
    %24 = tpu.matmul %23, %0, %cst_15 {dimension_numbers = #tpu.dot_dimension_numbers<[1], [0], [0], [1], [0, 0, 1, 1], [], []>} : vector<2x64xf32>, vector<64x8xf32>, vector<2x8xf32> -> vector<2x8xf32>
    %cst_16 = arith.constant 1.250000e-01 : f32
    %25 = vector.broadcast %cst_16 : f32 to vector<2x8xf32>
    %26 = arith.mulf %24, %25 : vector<2x8xf32>
    %cst_17 = arith.constant 9.99999974E-6 : f32
    %27 = vector.broadcast %cst_17 : f32 to vector<2x8xf32>
    %28 = arith.addf %26, %27 : vector<2x8xf32>
    %29 = math.rsqrt %28 : vector<2x8xf32>
    %cst_18 = arith.constant dense<0.000000e+00> : vector<2x64xf32>
    %30 = tpu.matmul %29, %1, %cst_18 {dimension_numbers = #tpu.dot_dimension_numbers<[1], [0], [0], [1], [0, 0, 1, 1], [], []>} : vector<2x8xf32>, vector<8x64xf32>, vector<2x64xf32> -> vector<2x64xf32>
    %31 = arith.mulf %22, %30 : vector<2x64xf32>
    %32 = vector.extract_strided_slice %5 {offsets = [1, 0], sizes = [1, 64], strides = [1, 1]} : vector<3x64xf32> to vector<1x64xf32>
    %33 = vector.broadcast %32 : vector<1x64xf32> to vector<2x64xf32>
    %34 = arith.mulf %31, %33 : vector<2x64xf32>
    %35 = vector.extract_strided_slice %5 {offsets = [2, 0], sizes = [1, 64], strides = [1, 1]} : vector<3x64xf32> to vector<1x64xf32>
    %36 = vector.broadcast %35 : vector<1x64xf32> to vector<2x64xf32>
    %37 = arith.addf %34, %36 : vector<2x64xf32>
    %38 = vector.extract_strided_slice %37 {offsets = [0, 0], sizes = [2, 32], strides = [1, 1]} : vector<2x64xf32> to vector<2x32xf32>
    %39 = vector.extract_strided_slice %37 {offsets = [0, 32], sizes = [2, 32], strides = [1, 1]} : vector<2x64xf32> to vector<2x32xf32>
    %c0_19 = arith.constant 0 : index
    %c0_20 = arith.constant 0 : index
    %c0_21 = arith.constant 0 : index
    %40 = vector.load %arg2[%c0_19, %c0_20, %c0_21] : memref<2x8x32xbf16, #tpu.memory_space<vmem>>, vector<2x8x32xbf16>
    %41 = vector.shape_cast %40 : vector<2x8x32xbf16> to vector<16x32xbf16>
    %c0_22 = arith.constant 0 : index
    %c0_23 = arith.constant 0 : index
    %42 = vector.load %arg6[%c0_22, %c0_23] : memref<32x64xbf16, #tpu.memory_space<vmem>>, vector<32x64xbf16>
    %c0_24 = arith.constant 0 : index
    %c0_25 = arith.constant 0 : index
    %43 = vector.load %arg7[%c0_24, %c0_25] : memref<3x64xf32, #tpu.memory_space<vmem>>, vector<3x64xf32>
    %cst_26 = arith.constant dense<0.000000e+00> : vector<16x64xf32>
    %44 = tpu.matmul %41, %42, %cst_26 {dimension_numbers = #tpu.dot_dimension_numbers<[1], [0], [0], [1], [0, 0, 1, 1], [], []>} : vector<16x32xbf16>, vector<32x64xbf16>, vector<16x64xf32> -> vector<16x64xf32>
    %45 = vector.extract_strided_slice %43 {offsets = [0, 0], sizes = [1, 64], strides = [1, 1]} : vector<3x64xf32> to vector<1x64xf32>
    %46 = vector.broadcast %45 : vector<1x64xf32> to vector<16x64xf32>
    %47 = arith.addf %44, %46 : vector<16x64xf32>
    %cst_27 = arith.constant 0.000000e+00 : f32
    %48 = vector.broadcast %cst_27 : f32 to vector<16x64xf32>
    %49 = arith.cmpf ogt, %47, %48 : vector<16x64xf32>
    %cst_28 = arith.constant 0.000000e+00 : f32
    %50 = vector.broadcast %cst_28 : f32 to vector<16x64xf32>
    %51 = arith.minimumf %47, %50 : vector<16x64xf32>
    %52 = math.exp %51 : vector<16x64xf32>
    %cst_29 = arith.constant 1.000000e+00 : f32
    %53 = vector.broadcast %cst_29 : f32 to vector<16x64xf32>
    %54 = arith.subf %52, %53 : vector<16x64xf32>
    %55 = arith.select %49, %47, %54 : vector<16x64xi1>, vector<16x64xf32>
    %cst_30 = arith.constant dense<0.000000e+00> : vector<16x8xf32>
    %56 = tpu.matmul %55, %0, %cst_30 {dimension_numbers = #tpu.dot_dimension_numbers<[1], [0], [0], [1], [0, 0, 1, 1], [], []>} : vector<16x64xf32>, vector<64x8xf32>, vector<16x8xf32> -> vector<16x8xf32>
    %cst_31 = arith.constant 1.250000e-01 : f32
    %57 = vector.broadcast %cst_31 : f32 to vector<16x8xf32>
    %58 = arith.mulf %56, %57 : vector<16x8xf32>
    %cst_32 = arith.constant dense<0.000000e+00> : vector<16x64xf32>
    %59 = tpu.matmul %58, %1, %cst_32 {dimension_numbers = #tpu.dot_dimension_numbers<[1], [0], [0], [1], [0, 0, 1, 1], [], []>} : vector<16x8xf32>, vector<8x64xf32>, vector<16x64xf32> -> vector<16x64xf32>
    %60 = arith.subf %55, %59 : vector<16x64xf32>
    %61 = arith.mulf %60, %60 : vector<16x64xf32>
    %cst_33 = arith.constant dense<0.000000e+00> : vector<16x8xf32>
    %62 = tpu.matmul %61, %0, %cst_33 {dimension_numbers = #tpu.dot_dimension_numbers<[1], [0], [0], [1], [0, 0, 1, 1], [], []>} : vector<16x64xf32>, vector<64x8xf32>, vector<16x8xf32> -> vector<16x8xf32>
    %cst_34 = arith.constant 1.250000e-01 : f32
    %63 = vector.broadcast %cst_34 : f32 to vector<16x8xf32>
    %64 = arith.mulf %62, %63 : vector<16x8xf32>
    %cst_35 = arith.constant 9.99999974E-6 : f32
    %65 = vector.broadcast %cst_35 : f32 to vector<16x8xf32>
    %66 = arith.addf %64, %65 : vector<16x8xf32>
    %67 = math.rsqrt %66 : vector<16x8xf32>
    %cst_36 = arith.constant dense<0.000000e+00> : vector<16x64xf32>
    %68 = tpu.matmul %67, %1, %cst_36 {dimension_numbers = #tpu.dot_dimension_numbers<[1], [0], [0], [1], [0, 0, 1, 1], [], []>} : vector<16x8xf32>, vector<8x64xf32>, vector<16x64xf32> -> vector<16x64xf32>
    %69 = arith.mulf %60, %68 : vector<16x64xf32>
    %70 = vector.extract_strided_slice %43 {offsets = [1, 0], sizes = [1, 64], strides = [1, 1]} : vector<3x64xf32> to vector<1x64xf32>
    %71 = vector.broadcast %70 : vector<1x64xf32> to vector<16x64xf32>
    %72 = arith.mulf %69, %71 : vector<16x64xf32>
    %73 = vector.extract_strided_slice %43 {offsets = [2, 0], sizes = [1, 64], strides = [1, 1]} : vector<3x64xf32> to vector<1x64xf32>
    %74 = vector.broadcast %73 : vector<1x64xf32> to vector<16x64xf32>
    %75 = arith.addf %72, %74 : vector<16x64xf32>
    %76 = vector.extract_strided_slice %75 {offsets = [0, 0], sizes = [16, 32], strides = [1, 1]} : vector<16x64xf32> to vector<16x32xf32>
    %77 = vector.extract_strided_slice %75 {offsets = [0, 32], sizes = [16, 32], strides = [1, 1]} : vector<16x64xf32> to vector<16x32xf32>
    %78 = vector.shape_cast %38 : vector<2x32xf32> to vector<2x1x32xf32>
    %79 = vector.shape_cast %76 : vector<16x32xf32> to vector<2x8x32xf32>
    %80 = vector.broadcast %78 : vector<2x1x32xf32> to vector<2x8x32xf32>
    %81 = arith.mulf %80, %79 : vector<2x8x32xf32>
    %82 = vector.shape_cast %81 : vector<2x8x32xf32> to vector<16x32xf32>
    %83 = arith.truncf %82 : vector<16x32xf32> to vector<16x32xbf16>
    %c0_37 = arith.constant 0 : index
    %c0_38 = arith.constant 0 : index
    %84 = vector.load %arg10[%c0_37, %c0_38] : memref<32x64xbf16, #tpu.memory_space<vmem>>, vector<32x64xbf16>
    %cst_39 = arith.constant dense<0.000000e+00> : vector<16x64xf32>
    %85 = tpu.matmul %83, %84, %cst_39 {dimension_numbers = #tpu.dot_dimension_numbers<[1], [0], [0], [1], [0, 0, 1, 1], [], []>} : vector<16x32xbf16>, vector<32x64xbf16>, vector<16x64xf32> -> vector<16x64xf32>
    %c0_40 = arith.constant 0 : index
    %c0_41 = arith.constant 0 : index
    %86 = vector.load %arg11[%c0_40, %c0_41] : memref<1x64xf32, #tpu.memory_space<vmem>>, vector<1x64xf32>
    %87 = vector.broadcast %86 : vector<1x64xf32> to vector<16x64xf32>
    %88 = arith.addf %85, %87 : vector<16x64xf32>
    %cst_42 = arith.constant 0.000000e+00 : f32
    %89 = vector.broadcast %cst_42 : f32 to vector<16x64xf32>
    %90 = arith.maximumf %88, %89 : vector<16x64xf32>
    %c0_43 = arith.constant 0 : index
    %c0_44 = arith.constant 0 : index
    %91 = vector.load %arg3[%c0_43, %c0_44] : memref<2x8xf32, #tpu.memory_space<vmem>>, vector<2x8xf32>
    %92 = vector.shape_cast %91 : vector<2x8xf32> to vector<2x8x1xf32>
    %93 = arith.truncf %90 : vector<16x64xf32> to vector<16x64xbf16>
    %c0_45 = arith.constant 0 : index
    %c0_46 = arith.constant 0 : index
    %94 = vector.load %arg12[%c0_45, %c0_46] : memref<64x4xbf16, #tpu.memory_space<vmem>>, vector<64x4xbf16>
    %cst_47 = arith.constant dense<0.000000e+00> : vector<16x4xf32>
    %95 = tpu.matmul %93, %94, %cst_47 {dimension_numbers = #tpu.dot_dimension_numbers<[1], [0], [0], [1], [0, 0, 1, 1], [], []>} : vector<16x64xbf16>, vector<64x4xbf16>, vector<16x4xf32> -> vector<16x4xf32>
    %c0_48 = arith.constant 0 : index
    %c0_49 = arith.constant 0 : index
    %96 = vector.load %arg13[%c0_48, %c0_49] : memref<1x4xf32, #tpu.memory_space<vmem>>, vector<1x4xf32>
    %97 = vector.broadcast %96 : vector<1x4xf32> to vector<16x4xf32>
    %98 = arith.addf %95, %97 : vector<16x4xf32>
    %99 = vector.shape_cast %98 : vector<16x4xf32> to vector<2x8x4xf32>
    %cst_50 = arith.constant 0.000000e+00 : f32
    %100 = vector.broadcast %cst_50 : f32 to vector<2x8x1xf32>
    %101 = arith.cmpf oeq, %92, %100 : vector<2x8x1xf32>
    %cst_51 = arith.constant -1.000000e+09 : f32
    %102 = vector.shape_cast %101 : vector<2x8x1xi1> to vector<2x8x1xi1>
    %103 = vector.broadcast %102 : vector<2x8x1xi1> to vector<2x8x4xi1>
    %104 = vector.broadcast %cst_51 : f32 to vector<2x8x4xf32>
    %105 = arith.select %103, %104, %99 : vector<2x8x4xi1>, vector<2x8x4xf32>
    %cst_52 = arith.constant dense<0xFF800000> : vector<2x4xf32>
    %106 = vector.multi_reduction <maximumf>, %105, %cst_52 [1] : vector<2x8x4xf32> to vector<2x4xf32>
    %107 = vector.shape_cast %106 : vector<2x4xf32> to vector<2x1x4xf32>
    %108 = vector.broadcast %107 : vector<2x1x4xf32> to vector<2x8x4xf32>
    %109 = arith.subf %105, %108 : vector<2x8x4xf32>
    %110 = math.exp %109 : vector<2x8x4xf32>
    %cst_53 = arith.constant dense<0.000000e+00> : vector<2x4xf32>
    %111 = vector.multi_reduction <add>, %110, %cst_53 [1] : vector<2x8x4xf32> to vector<2x4xf32>
    %112 = vector.shape_cast %111 : vector<2x4xf32> to vector<2x1x4xf32>
    %113 = vector.broadcast %112 : vector<2x1x4xf32> to vector<2x8x4xf32>
    %114 = arith.divf %110, %113 : vector<2x8x4xf32>
    %cst_54 = arith.constant dense<0.000000e+00> : vector<2xf32>
    %115 = vector.multi_reduction <add>, %91, %cst_54 [1] : vector<2x8xf32> to vector<2xf32>
    %116 = vector.shape_cast %115 : vector<2xf32> to vector<2x1xf32>
    %117 = vector.shape_cast %90 : vector<16x64xf32> to vector<2x8x64xf32>
    %118 = vector.broadcast %92 : vector<2x8x1xf32> to vector<2x8x64xf32>
    %119 = arith.mulf %117, %118 : vector<2x8x64xf32>
    %cst_55 = arith.constant dense<0.000000e+00> : vector<2x64xf32>
    %120 = vector.multi_reduction <add>, %119, %cst_55 [1] : vector<2x8x64xf32> to vector<2x64xf32>
    %121 = vector.broadcast %116 : vector<2x1xf32> to vector<2x64xf32>
    %122 = arith.divf %120, %121 : vector<2x64xf32>
    %123 = arith.truncf %122 : vector<2x64xf32> to vector<2x64xbf16>
    %c0_56 = arith.constant 0 : index
    %c0_57 = arith.constant 0 : index
    %124 = vector.load %arg14[%c0_56, %c0_57] : memref<64x32xbf16, #tpu.memory_space<vmem>>, vector<64x32xbf16>
    %cst_58 = arith.constant dense<0.000000e+00> : vector<2x32xf32>
    %125 = tpu.matmul %123, %124, %cst_58 {dimension_numbers = #tpu.dot_dimension_numbers<[1], [0], [0], [1], [0, 0, 1, 1], [], []>} : vector<2x64xbf16>, vector<64x32xbf16>, vector<2x32xf32> -> vector<2x32xf32>
    %c0_59 = arith.constant 0 : index
    %c0_60 = arith.constant 0 : index
    %126 = vector.load %arg15[%c0_59, %c0_60] : memref<1x32xf32, #tpu.memory_space<vmem>>, vector<1x32xf32>
    %127 = vector.broadcast %126 : vector<1x32xf32> to vector<2x32xf32>
    %128 = arith.addf %125, %127 : vector<2x32xf32>
    %129 = arith.negf %128 : vector<2x32xf32>
    %130 = math.exp %129 : vector<2x32xf32>
    %cst_61 = arith.constant 1.000000e+00 : f32
    %131 = vector.broadcast %cst_61 : f32 to vector<2x32xf32>
    %132 = arith.addf %131, %130 : vector<2x32xf32>
    %133 = arith.divf %131, %132 : vector<2x32xf32>
    %134 = vector.shape_cast %114 : vector<2x8x4xf32> to vector<16x4xf32>
    %cst_62 = arith.constant dense<0.000000e+00> : vector<16x32xf32>
    %135 = tpu.matmul %134, %2, %cst_62 {dimension_numbers = #tpu.dot_dimension_numbers<[1], [0], [0], [1], [0, 0, 1, 1], [], []>} : vector<16x4xf32>, vector<4x32xf32>, vector<16x32xf32> -> vector<16x32xf32>
    %136 = arith.mulf %135, %77 : vector<16x32xf32>
    %137 = vector.shape_cast %136 : vector<16x32xf32> to vector<2x8x32xf32>
    %cst_63 = arith.constant dense<0.000000e+00> : vector<2x32xf32>
    %138 = vector.multi_reduction <add>, %137, %cst_63 [1] : vector<2x8x32xf32> to vector<2x32xf32>
    %139 = arith.mulf %39, %138 : vector<2x32xf32>
    %140 = arith.mulf %139, %133 : vector<2x32xf32>
    %c0_64 = arith.constant 0 : index
    %c0_65 = arith.constant 0 : index
    %141 = vector.load %arg16[%c0_64, %c0_65] : memref<2x32xf32, #tpu.memory_space<vmem>>, vector<2x32xf32>
    tpu.vector_store %arg16[%c0_64, %c0_65], %140 {strides = array<i32>} : memref<2x32xf32, #tpu.memory_space<vmem>>, vector<2x32xf32>,
    return
  }
  func.func @transform_0(%arg0: i32) -> (i32, i32) {
    %c0_i32 = arith.constant 0 : i32
    %c0_i32_0 = arith.constant 0 : i32
    return %arg0, %c0_i32 : i32, i32
  }
  func.func @transform_1(%arg0: i32) -> (i32, i32, i32) {
    %c0_i32 = arith.constant 0 : i32
    %c0_i32_0 = arith.constant 0 : i32
    %c0_i32_1 = arith.constant 0 : i32
    return %arg0, %c0_i32, %c0_i32_0 : i32, i32, i32
  }
  func.func @transform_2(%arg0: i32) -> (i32, i32) {
    %c0_i32 = arith.constant 0 : i32
    %c0_i32_0 = arith.constant 0 : i32
    return %arg0, %c0_i32 : i32, i32
  }
  func.func @transform_3(%arg0: i32) -> (i32, i32) {
    %c0_i32 = arith.constant 0 : i32
    %c0_i32_0 = arith.constant 0 : i32
    %c0_i32_1 = arith.constant 0 : i32
    return %c0_i32, %c0_i32_0 : i32, i32
  }
  func.func @transform_4(%arg0: i32) -> (i32, i32) {
    %c0_i32 = arith.constant 0 : i32
    %c0_i32_0 = arith.constant 0 : i32
    %c0_i32_1 = arith.constant 0 : i32
    return %c0_i32, %c0_i32_0 : i32, i32
  }
  func.func @transform_5(%arg0: i32) -> (i32, i32) {
    %c0_i32 = arith.constant 0 : i32
    %c0_i32_0 = arith.constant 0 : i32
    %c0_i32_1 = arith.constant 0 : i32
    return %c0_i32, %c0_i32_0 : i32, i32
  }
  func.func @transform_6(%arg0: i32) -> (i32, i32) {
    %c0_i32 = arith.constant 0 : i32
    %c0_i32_0 = arith.constant 0 : i32
    %c0_i32_1 = arith.constant 0 : i32
    return %c0_i32, %c0_i32_0 : i32, i32
  }
  func.func @transform_7(%arg0: i32) -> (i32, i32) {
    %c0_i32 = arith.constant 0 : i32
    %c0_i32_0 = arith.constant 0 : i32
    %c0_i32_1 = arith.constant 0 : i32
    return %c0_i32, %c0_i32_0 : i32, i32
  }
  func.func @transform_8(%arg0: i32) -> (i32, i32) {
    %c0_i32 = arith.constant 0 : i32
    %c0_i32_0 = arith.constant 0 : i32
    %c0_i32_1 = arith.constant 0 : i32
    return %c0_i32, %c0_i32_0 : i32, i32
  }
  func.func @transform_9(%arg0: i32) -> (i32, i32) {
    %c0_i32 = arith.constant 0 : i32
    %c0_i32_0 = arith.constant 0 : i32
    %c0_i32_1 = arith.constant 0 : i32
    return %c0_i32, %c0_i32_0 : i32, i32
  }
  func.func @transform_10(%arg0: i32) -> (i32, i32) {
    %c0_i32 = arith.constant 0 : i32
    %c0_i32_0 = arith.constant 0 : i32
    %c0_i32_1 = arith.constant 0 : i32
    return %c0_i32, %c0_i32_0 : i32, i32
  }
  func.func @transform_11(%arg0: i32) -> (i32, i32) {
    %c0_i32 = arith.constant 0 : i32
    %c0_i32_0 = arith.constant 0 : i32
    %c0_i32_1 = arith.constant 0 : i32
    return %c0_i32, %c0_i32_0 : i32, i32
  }
  func.func @transform_12(%arg0: i32) -> (i32, i32) {
    %c0_i32 = arith.constant 0 : i32
    %c0_i32_0 = arith.constant 0 : i32
    %c0_i32_1 = arith.constant 0 : i32
    return %c0_i32, %c0_i32_0 : i32, i32
  }
  func.func @transform_13(%arg0: i32) -> (i32, i32) {
    %c0_i32 = arith.constant 0 : i32
    %c0_i32_0 = arith.constant 0 : i32
    %c0_i32_1 = arith.constant 0 : i32
    return %c0_i32, %c0_i32_0 : i32, i32
  }
  func.func @transform_14(%arg0: i32) -> (i32, i32) {
    %c0_i32 = arith.constant 0 : i32
    %c0_i32_0 = arith.constant 0 : i32
    %c0_i32_1 = arith.constant 0 : i32
    return %c0_i32, %c0_i32_0 : i32, i32
  }
  func.func @transform_15(%arg0: i32) -> (i32, i32) {
    %c0_i32 = arith.constant 0 : i32
    %c0_i32_0 = arith.constant 0 : i32
    return %arg0, %c0_i32 : i32, i32
  }
}

</mosaic_0001>

<bundles_post_ra>
// kernel: tpu_custom_call.1
= control target key start
LH: loop header
LB: loop body
LE: loop exit
PB: predicated region body
PF: predicated region fallthrough
CT: control target
= control target key end

     0   :  { %v1787_v1 = vmov 0.0   ;;  %vm1788_vm0 = vmmov 0   ;;  %vm83_vm1 = vcmask 261120   ;;  %s2122_s0 = inlined_call_operand.vmem [shape: bf16[2,32], index: 0, kind: input, shape index: {}]   ;;  %s2123_s1 = inlined_call_operand.vmem [shape: bf16[2,8,32], index: 1, kind: input, shape index: {}]   ;;  %s2124_s2 = inlined_call_operand.vmem [shape: f32[2,8], index: 2, kind: input, shape index: {}]   ;;  %s2125_s3 = inlined_call_operand.vmem [shape: bf16[32,64], index: 3, kind: input, shape index: {}]   ;;  %s2126_s4 = inlined_call_operand.vmem [shape: f32[3,64], index: 4, kind: input, shape index: {}]   ;;  %s2127_s5 = inlined_call_operand.vmem [shape: bf16[32,64], index: 5, kind: input, shape index: {}]   ;;  %s2128_s6 = inlined_call_operand.vmem [shape: f32[3,64], index: 6, kind: input, shape index: {}]   ;;  %s2129_s7 = inlined_call_operand.vmem [shape: f32[64,8], index: 7, kind: input, shape index: {}]   ;;  %s2130_s8 = inlined_call_operand.vmem [shape: f32[8,64], index: 8, kind: input, shape index: {}]   ;;  %s2131_s9 = inlined_call_operand.vmem [shape: bf16[32,64], index: 9, kind: input, shape index: {}]   ;;  %s2132_s10 = inlined_call_operand.vmem [shape: f32[1,64], index: 10, kind: input, shape index: {}]   ;;  %s2133_s11 = inlined_call_operand.vmem [shape: bf16[64,4], index: 11, kind: input, shape index: {}]   ;;  %s2134_s12 = inlined_call_operand.vmem [shape: f32[1,4], index: 12, kind: input, shape index: {}]   ;;  %s2135_s13 = inlined_call_operand.vmem [shape: bf16[64,32], index: 13, kind: input, shape index: {}]   ;;  %s2136_s14 = inlined_call_operand.vmem [shape: f32[1,32], index: 14, kind: input, shape index: {}]   ;;  %s2137_s15 = inlined_call_operand.hbm [shape: f32[2,32], index: 15, kind: output, shape index: {}]  }
   0x1   :  { %v1720_v0 = vld [vmem:[%s2125_s3] sm:$0xff]   ;;  %1508 = vmatprep.subr.bf16.mxu0 %v1787_v1  ;;  %v1721_v2 = vld [vmem:[%s2125_s3 + $0x8] sm:$0xff]   ;;  %1512 = vmatprep.mubr.msk.bf16.mxu0 %vm1788_vm0, %v1787_v1 }
   0x2   :  { %1509 = vmatpush3.bf16.msra.mxu0 %v1720_v0  ;;  %1532 = vmatprep.mubr.msk.f32.mxu1 %vm1788_vm0, %v1787_v1  ;;  %v61_v3 = vld [vmem:[%s2122_s0] sm:$0x1] }
   0x3   :  { %1510 = vmatprep.subr.bf16.mxu0 %v1787_v1 }
   0x6   :  { %1511 = vmatpush3.bf16.msra.mxu0 %v1721_v2 }
   0x7   :  { %1535 = vmatprep.subr.mxu0 %v1787_v1 }
   0x9   :  { %1513 = vmatmul.mubr.msk.bf16.vlgmr.msra.gmra.mrb[0].mxu0 %vm83_vm1, %v61_v3 }
   0xa   :  { %1537 = vmatprep.mubr.msk.f32.mxu0 %vm1788_vm0, %v1787_v1 }
   0xb   :  { %20 = vsyncpa [#allocation3], 0  ;;  %v52_v4 = vld [vmem:[%s2129_s7] sm:$0xff]  ;;  %v53_v5 = vld [vmem:[%s2129_s7 + $0x8] sm:$0xff]  ;;  %v1789_v7 = vmov 0.0|0.0   ;;  %v67_v18 = vlaneseq  ;;  %vm133_vm2 = vcmask 523264  }
   0xc   :  { %v1899_v6 = vpack.c.bf16 %v53_v5, %v52_v4  ;;  %1657 = vmatprep.subr.bf16.mxu1 %v1789_v7  ;;  %v54_v8 = vld [vmem:[%s2129_s7 + $0x10] sm:$0xff]  ;;  %v55_v9 = vld [vmem:[%s2129_s7 + $0x18] sm:$0xff]  ;;  %v56_v10 = vld [vmem:[%s2129_s7 + $0x20] sm:$0xff]  ;;  %vm208_vm4 = vcmask 64512   ;;  %vm1129_vm7 = vcmask 58368   ;;  %s1791_s20 = smov 96  }
   0xd   :  { %v1911_v11 = vpack.c.bf16 %v55_v9, %v54_v8  ;;  %v57_v12 = vld [vmem:[%s2129_s7 + $0x28] sm:$0xff]  ;;  %v58_v14 = vld [vmem:[%s2129_s7 + $0x30] sm:$0xff]  ;;  %v59_v15 = vld [vmem:[%s2129_s7 + $0x38] sm:$0xff]  ;;  %v1936_v19 = vshrl.u32 %v67_v18, 7  ;;  %vm1179_vm8 = vcmask 1041409   ;;  %vm1261_vm9 = vcmask 1043456  }
   0xe   :  { %1659 = vmatpush3.bf16.msra.mxu1 %v1899_v6  ;;  %v1917_v13 = vpack.c.bf16 %v57_v12, %v56_v10  ;;  %v1926_v16 = vpack.c.bf16 %v59_v15, %v58_v14  ;;  %v1933_v17 = vld [vmem:[%s2130_s8] sm:$0xff]  ;;  %v1723_v46 = vld [vmem:[%s2127_s5 + $0x8] sm:$0xff]   ;;  %vm1090_vm10 = vcmask 31744   ;;  %vm1380_vm13 = vcmask 254976  }
   0xf   :  { %1660 = vmatprep.subr.bf16.mxu1 %v1789_v7  ;;  %1536 = vmatpush3.msra.mxu0 %v1933_v17  ;;  %v1939_v20 = vsub.s32 0, %v1936_v19  ;;  %v1944_v21 = vld [vmem:[%s2126_s4] sm:$0x7] }
  0x10   :  { %1669 = vmatprep.subr.bf16.mxu0 %v1789_v7  ;;  %v1722_v44 = vld [vmem:[%s2127_s5] sm:$0xff]  }
  0x11   :  { %v70_v22 = vrot.slane %v1944_v21, %v1939_v20  ;;  %v1724_v47 = vld [vmem:[%s2123_s1] sm:$0xff]  }
  0x12   :  { %1662 = vmatpush3.bf16.msra.mxu1 %v1911_v11  ;;  %v1996_v50 = vld [vmem:[%s2128_s6] sm:$0x7]  ;;  %s1793_s6 = smov [#allocation2]  }
  0x13   :  { %1663 = vmatprep.subr.bf16.mxu1 %v1789_v7  ;;  %v454_v51 = vrot.slane %v1996_v50, %v1939_v20  ;;  %s1388_s28 = sshll.u32 %s1793_s6, 4  ;;  %s1389_s28 = int_to_ptr.vmem [resolvable:$true] %s1388_s28 }
  0x14   :  { %p1768_p1 = scmp.lt.s32.totalorder %s1389_s28, %s1389_s28 }
  0x16   :  { %1665 = vmatpush3.bf16.msra.mxu1 %v1917_v13 }
  0x17   :  { %1666 = vmatprep.subr.bf16.mxu1 %v1789_v7 }
  0x1a   :  { %1668 = vmatpush3.bf16.msra.mxu1 %v1926_v16 }
  0x1b   :  { %1559 = vmatprep.subr.mxu1 %v1787_v1 }
  0xdc   :  { %v121_v23 = vpop.f32.mrb[0].mxu0 }
  0xdd   :  { %v122_v24 = vadd.f32 %v121_v23, %v70_v22  ;;  %v1514_v25 = vpop.f32.mrb[1].mxu0 }
  0xde   :  { %v124_v26 = vpop.f32.mrb[2].mxu0 }
  0xdf   :  { %v128_v27 = vmin.f32 %v122_v24, 0.0  ;;  %v1515_v28 = vpop.f32.mrb[3].mxu0  ;;  %vm127_vm3 = vcmp.gt.f32.partialorder %v122_v24, 0.0 }
  0xe1   :  { %v129_v29 = vmul.f32 1.442695, %v128_v27 }
  0xe3   :  { %1735 = vpow2.f32 %v129_v29 }
  0xed   :  { %v1736_v30 = vpop.eup %1735 }
  0xee   :  { %v1399_v31 = vadd.f32 -1.0, %v1736_v30  ;;  %v436_v30 = vsub.s32 1, %v1936_v19 }
  0xf0   :  { %v132_v32 = vsel %vm127_vm3, %v122_v24, %v1399_v31 }
  0xf1   :  { %1533 = vmatmul.mubr.msk.f32.vlgmr.msra.gmra.mrb[0].mxu1 %vm133_vm2, %v132_v32 }
  0xf2   :  { %1560 = vmatpush3.msra.mxu1 %v1933_v17  ;;  %1561 = vmatprep.mubr.msk.f32.mxu1 %vm1788_vm0, %v1787_v1 }
  0xf3   :  { %1564 = vmatprep.subr.bf16.mxu1 %v1787_v1 }
 0x1c4   :  { %v203_v33 = vpop.f32.mrb[0].mxu1 }
 0x1c5   :  { %v207_v34 = vmul.f32 0.125, %v203_v33  ;;  %v1534_v35 = vpop.f32.mrb[1].mxu1  ;;  %v1726_v33 = vld [vmem:[%s2131_s9 + $0x8] sm:$0xff]  }
 0x1c6   :  { %v437_v35 = vrot.slane %v1944_v21, %v436_v30 }
 0x1c7   :  { %1538 = vmatmul.mubr.msk.f32.vlgmr.msra.gmra.mrb[4].mxu0 %vm208_vm4, %v207_v34 }
 0x1c8   :  { %1671 = vmatpush3.bf16.msra.mxu0 %v1899_v6  ;;  %1556 = vmatprep.mubr.msk.f32.mxu0 %vm1788_vm0, %v1787_v1 }
 0x1c9   :  { %1672 = vmatprep.subr.bf16.mxu0 %v1789_v7 }
 0x1cc   :  { %1674 = vmatpush3.bf16.msra.mxu0 %v1911_v11 }
 0x1cd   :  { %1675 = vmatprep.subr.bf16.mxu0 %v1789_v7 }
 0x1d0   :  { %1677 = vmatpush3.bf16.msra.mxu0 %v1917_v13 }
 0x1d1   :  { %1678 = vmatprep.subr.bf16.mxu0 %v1789_v7 }
 0x1d4   :  { %1680 = vmatpush3.bf16.msra.mxu0 %v1926_v16 }
 0x1d5   :  { %1591 = vmatprep.subr.mxu0 %v1933_v17 }
 0x29a   :  { %v278_v36 = vpop.f32.mrb[4].mxu0 }
 0x29b   :  { %v1961_v37 = vsub.f32 %v132_v32, %v278_v36  ;;  %v1539_v38 = vpop.f32.mrb[5].mxu0  ;;  %v1725_v32 = vld [vmem:[%s2131_s9] sm:$0xff]   ;;  %v441_v36 = vsub.s32 2, %v1936_v19 }
 0x29c   :  { %v1790_v38 = vmov 1966171168  }
 0x29d   :  { %v283_v39 = vmul.f32 %v1961_v37, %v1961_v37 }
 0x29f   :  { %1557 = vmatmul.mubr.msk.f32.vlgmr.msra.gmra.mrb[6].mxu0 %vm133_vm2, %v283_v39  ;;  %v880_v39 = vunpack.c.l.s4 %v1790_v38 }
 0x2a0   :  { %1592 = vmatpush3.msra.mxu0 %v1933_v17 }
 0x2a1   :  { %1698 = vmatprep.subr.bf16.mxu0 %v1899_v6 }
 0x372   :  { %v353_v40 = vpop.f32.mrb[6].mxu0 }
 0x373   :  { %v357_v41 = vmul.f32 0.125, %v353_v40  ;;  %v1558_v42 = vpop.f32.mrb[7].mxu0 }
 0x374   :  { %v881_v42 = vunpack.c.0.s8 %v880_v39 }
 0x375   :  { %v358_v43 = vadd.f32 1e-05, %v357_v41  ;;  %v442_v41 = vrot.slane %v1944_v21, %v441_v36  ;;  %v869_v21 = vrot.slane %v1996_v50, %v436_v30 }
 0x377   :  { %1737 = vrsqrt.f32 %v358_v43 }
 0x381   :  { %v1738_v45 = vpop.eup %1737 }
 0x382   :  { %1562 = vmatmul.mubr.msk.f32.vlgmr.msra.gmra.mrb[2].mxu1 %vm208_vm4, %v1738_v45 }
 0x383   :  { %1565 = vmatpush3.bf16.msra.mxu1 %v1722_v44  ;;  %1568 = vmatprep.mubr.msk.bf16.mxu1 %vm1788_vm0, %v1787_v1  ;;  %v884_v44 = vsub.s32 %v881_v42, %v1936_v19 }
 0x384   :  { %1566 = vmatprep.subr.bf16.mxu1 %v1787_v1 }
 0x387   :  { %1567 = vmatpush3.bf16.msra.mxu1 %v1723_v46  ;;  %v1728_v46 = vld [vmem:[%s2133_s11 + $0x8] sm:$0xff]  }
 0x388   :  { %1682 = vmatprep.subr.bf16.mxu1 %v1899_v6 }
 0x38a   :  { %1569 = vmatmul.mubr.msk.bf16.vlgmr.msra.gmra.mrb[4].mxu1 %vm83_vm1, %v1724_v47 }
 0x38b   :  { %1684 = vmatpush3.bf16.msra.mxu1 %v1899_v6 }
 0x38c   :  { %1686 = vmatprep.subr.bf16.mxu1 %v1911_v11 }
 0x38f   :  { %1688 = vmatpush3.bf16.msra.mxu1 %v1911_v11 }
 0x390   :  { %1690 = vmatprep.subr.bf16.mxu1 %v1917_v13 }
 0x393   :  { %1692 = vmatpush3.bf16.msra.mxu1 %v1917_v13 }
 0x394   :  { %1694 = vmatprep.subr.bf16.mxu1 %v1926_v16 }
 0x397   :  { %1696 = vmatpush3.bf16.msra.mxu1 %v1926_v16 }
 0x398   :  { %1615 = vmatprep.subr.mxu1 %v1933_v17 }
 0x455   :  { %v1991_v48 = vpop.f32.mrb[2].mxu1 }
 0x456   :  { %v1563_v49 = vpop.f32.mrb[3].mxu1  ;;  %v433_v34 = vmul.f32 %v1991_v48, %v1961_v37  ;;  %v1727_v37 = vld [vmem:[%s2133_s11] sm:$0xff]  }
 0x458   :  { %v438_v40 = vmul.f32 %v437_v35, %v433_v34 }
 0x45a   :  { %v2040_v43 = vadd.f32 %v442_v41, %v438_v40 }
 0x45c   :  { %v885_v45 = vrot.slane %v2040_v43, %v884_v44 }
 0x45d   :  { %v509_v52 = vpop.f32.mrb[4].mxu1 }
 0x45e   :  { %v510_v53 = vadd.f32 %v509_v52, %v454_v51  ;;  %v1570_v54 = vpop.f32.mrb[5].mxu1  ;;  %v886_v47 = vcombine.high %v885_v45, %v885_v45 }
 0x45f   :  { %v512_v55 = vpop.f32.mrb[6].mxu1 }
 0x460   :  { %v518_v56 = vmin.f32 %v510_v53, 0.0  ;;  %v513_v57 = vadd.f32 %v512_v55, %v454_v51  ;;  %v1571_v58 = vpop.f32.mrb[7].mxu1  ;;  %vm516_vm5 = vcmp.gt.f32.partialorder %v510_v53, 0.0  ;;  %v875_v51 = vrot.slane %v1996_v50, %v441_v36 }
 0x461   :  { %v900_v52 = vrot.slane %v886_v47, %v884_v44 }
 0x462   :  { %v520_v59 = vmul.f32 1.442695, %v518_v56  ;;  %v519_v60 = vmin.f32 %v513_v57, 0.0  ;;  %vm517_vm6 = vcmp.gt.f32.partialorder %v513_v57, 0.0 }
 0x463   :  { %v908_v58 = vrot.slane %v900_v52, %v1939_v20 }
 0x464   :  { %1739 = vpow2.f32 %v520_v59  ;;  %v522_v61 = vmul.f32 1.442695, %v519_v60 }
 0x466   :  { %1741 = vpow2.f32 %v522_v61 }
 0x46e   :  { %v1740_v62 = vpop.eup %1739 }
 0x46f   :  { %v1408_v63 = vadd.f32 -1.0, %v1740_v62 }
 0x470   :  { %v1742_v0 = vpop.eup %1741 }
 0x471   :  { %v1409_v2 = vadd.f32 -1.0, %v1742_v0  ;;  %v526_v3 = vsel %vm516_vm5, %v510_v53, %v1408_v63  ;;  %v893_v53 = vrot.slane %v885_v45, %v884_v44  ;;  %v1729_v63 = vld [vmem:[%s2133_s11 + $0x10] sm:$0xff]   ;;  %v1731_v0 = vld [vmem:[%s2135_s13] sm:$0xff]  }
 0x472   :  { %1588 = vmatprep.mubr.msk.f32.mxu1 %vm133_vm2, %v526_v3 }
 0x473   :  { %v527_v4 = vsel %vm517_vm6, %v513_v57, %v1409_v2  ;;  %v904_v60 = vrot.slane %v893_v53, %v1939_v20  ;;  %v1732_v2 = vld [vmem:[%s2135_s13 + $0x8] sm:$0xff]  }
 0x474   :  { %1589 = vmatmul.mubr.msk.f32.vlgmr.msra.gmra.mrb[8].mxu1 %vm133_vm2, %v527_v4 }
 0x475   :  { %1616 = vmatpush3.msra.mxu1 %v1933_v17 }
 0x476   :  { %1620 = vmatprep.subr.bf16.mxu1 %v1787_v1 }
 0x547   :  { %v1590_v5 = vpop.f32.mrb[8].mxu1 }
 0x548   :  { %v600_v7 = vpop.f32.mrb[9].mxu1  ;;  %v610_v9 = vmul.f32 0.125, %v1590_v5  ;;  %v1418_v5 = vld [vmem:[%s2132_s10] ss:$0 sm:$0xff] }
 0x549   :  { %v609_v8 = vmul.f32 0.125, %v600_v7 }
 0x54b   :  { %1593 = vmatprep.mubr.msk.f32.mxu0 %vm208_vm4, %v609_v8 }
 0x54c   :  { %1594 = vmatmul.mubr.msk.f32.vlgmr.msra.gmra.mrb[8].mxu0 %vm208_vm4, %v610_v9 }
 0x54d   :  { %1700 = vmatpush3.bf16.msra.mxu0 %v1899_v6 }
 0x54e   :  { %1702 = vmatprep.subr.bf16.mxu0 %v1911_v11 }
 0x551   :  { %1704 = vmatpush3.bf16.msra.mxu0 %v1911_v11  ;;  %v983_v11 = vld [vmem:[%s2124_s2] sm:$0x3]  ;;  %s1763_s2 = scalar_lea.vmem %s1389_s28, 32 }
 0x552   :  { %1706 = vmatprep.subr.bf16.mxu0 %v1917_v13  ;;  %v994_v31 = vrot.slane %v983_v11, %v436_v30  ;;  %p1764_p0 = scmp.ne.s32.totalorder %s1389_s28, %s1763_s2  ;;  %p1769_p2 = scmp.lt.s32.totalorder %s1763_s2, %s1763_s2 }
 0x554   :  { %p1770_p3 = por %p1769_p2, %p1768_p1 }
 0x555   :  { %1708 = vmatpush3.bf16.msra.mxu0 %v1917_v13  ;;  %v1130_v13 = vsel %vm1129_vm7, %v983_v11, 0.0 }
 0x556   :  { %1710 = vmatprep.subr.bf16.mxu0 %v1926_v16  ;;  %1131 = vadd.xlane.f32.xlu1 %v1130_v13  ;;  %p1771_p4 = pnand %p1770_p3, %p1764_p0 }
 0x559   :  { %1712 = vmatpush3.bf16.msra.mxu0 %v1926_v16  ;;  %v987_v16 = vrot.slane %v983_v11, %v1939_v20  ;;  %v1730_v20 = vld [vmem:[%s2133_s11 + $0x18] sm:$0xff]  }
 0x55a   :  { %1628 = vmatprep.subr.bf16.mxu0 %v1787_v1 }
 0x55b   :  { %989 = vbcast.lane.b32.xlu0 %v987_v16, 256 }
 0x55f   :  { %996 = vbcast.lane.b32.xlu0 %v994_v31, 256 }
 0x5cd   :  { %v990_v7 = vpop.permute.xlu0 %989 }
 0x5ce   :  { %vm1082_vm11 = vcmp.eq.f32.partialorder %v990_v7, 0.0 }
 0x5d1   :  { %v997_v16 = vpop.permute.xlu0 %996 }
 0x5d2   :  { %vm1083_vm12 = vcmp.eq.f32.partialorder %v997_v16, 0.0 }
 0x61f   :  { %v1595_v10 = vpop.f32.mrb[8].mxu0 }
 0x620   :  { %v693_v12 = vsub.f32 %v527_v4, %v1595_v10  ;;  %v683_v14 = vpop.f32.mrb[9].mxu0  ;;  %v1734_v4 = vld [vmem:[%s2135_s13 + $0x18] sm:$0xff]  }
 0x621   :  { %v692_v15 = vsub.f32 %v526_v3, %v683_v14  ;;  %v1733_v3 = vld [vmem:[%s2135_s13 + $0x10] sm:$0xff]  }
 0x622   :  { %v695_v6 = vmul.f32 %v693_v12, %v693_v12 }
 0x623   :  { %v694_v18 = vmul.f32 %v692_v15, %v692_v15 }
 0x625   :  { %1612 = vmatprep.mubr.msk.f32.mxu0 %vm133_vm2, %v694_v18 }
 0x626   :  { %1613 = vmatmul.mubr.msk.f32.vlgmr.msra.gmra.mrb[10].mxu0 %vm133_vm2, %v695_v6  ;;  %v1132_v6 = vpop.xlane.xlu1 %1131 }
 0x627   :  { %1636 = vmatprep.mubr.msk.bf16.mxu0 %vm1788_vm0, %v1787_v1  ;;  %1629 = vmatpush3.bf16.msra.mxu0 %v1727_v37  ;;  %v1150_v11 = vrot.slane %v1132_v6, 1 }
 0x628   :  { %1630 = vmatprep.subr.bf16.mxu0 %v1787_v1 }
 0x62b   :  { %1631 = vmatpush3.bf16.msra.mxu0 %v1728_v46 }
 0x62c   :  { %1632 = vmatprep.subr.bf16.mxu0 %v1787_v1 }
 0x62f   :  { %1633 = vmatpush3.bf16.msra.mxu0 %v1729_v63 }
 0x630   :  { %1634 = vmatprep.subr.bf16.mxu0 %v1787_v1 }
 0x633   :  { %1635 = vmatpush3.bf16.msra.mxu0 %v1730_v20 }
 0x634   :  { %1652 = vmatprep.subr.msk.mxu0 %vm1261_vm9, %v1933_v17 }
 0x6f9   :  { %v1614_v22 = vpop.f32.mrb[10].mxu0 }
 0x6fa   :  { %v778_v23 = vmul.f32 0.125, %v1614_v22  ;;  %v768_v24 = vpop.f32.mrb[11].mxu0 }
 0x6fb   :  { %v777_v25 = vmul.f32 0.125, %v768_v24 }
 0x6fc   :  { %v780_v26 = vadd.f32 1e-05, %v778_v23 }
 0x6fd   :  { %v779_v27 = vadd.f32 1e-05, %v777_v25 }
 0x6ff   :  { %1743 = vrsqrt.f32 %v779_v27 }
 0x700   :  { %1745 = vrsqrt.f32 %v780_v26 }
 0x701   :  { %1747 = vrcp.f32 %v1132_v6 }
 0x702   :  { %1749 = vrcp.f32 %v1150_v11 }
 0x709   :  { %v1744_v28 = vpop.eup %1743 }
 0x70a   :  { %v1746_v29 = vpop.eup %1745  ;;  %1617 = vmatprep.mubr.msk.f32.mxu1 %vm208_vm4, %v1744_v28 }
 0x70b   :  { %1618 = vmatmul.mubr.msk.f32.vlgmr.msra.gmra.mrb[10].mxu1 %vm208_vm4, %v1746_v29  ;;  %v1748_v35 = vpop.eup %1747 }
 0x70c   :  { %1624 = vmatprep.mubr.msk.bf16.mxu1 %vm1788_vm0, %v1787_v1  ;;  %1621 = vmatpush3.bf16.msra.mxu1 %v1725_v32  ;;  %v1750_v39 = vpop.eup %1749 }
 0x70d   :  { %1622 = vmatprep.subr.bf16.mxu1 %v1787_v1 }
 0x710   :  { %1623 = vmatpush3.bf16.msra.mxu1 %v1726_v33 }
 0x711   :  { %1640 = vmatprep.subr.bf16.mxu1 %v1787_v1 }
 0x7de   :  { %v1619_v48 = vpop.f32.mrb[10].mxu1 }
 0x7df   :  { %v865_v49 = vmul.f32 %v1619_v48, %v693_v12  ;;  %v855_v19 = vpop.f32.mrb[11].mxu1 }
 0x7e0   :  { %v864_v54 = vmul.f32 %v855_v19, %v692_v15 }
 0x7e1   :  { %v871_v55 = vmul.f32 %v869_v21, %v865_v49  ;;  %v1422_v49 = vld [vmem:[%s2134_s12] ss:$0 sm:$0xff] }
 0x7e2   :  { %v870_v56 = vmul.f32 %v869_v21, %v864_v54 }
 0x7e3   :  { %v877_v57 = vadd.f32 %v875_v51, %v871_v55 }
 0x7e4   :  { %v876_v59 = vadd.f32 %v875_v51, %v870_v56 }
 0x7e5   :  { %1344 = vrot.lane.b32.xlu0 %v877_v57, %s1791_s20  ;;  %v912_v61 = vmul.f32 %v908_v58, %v877_v57 }
 0x7e6   :  { %1342 = vrot.lane.b32.xlu1 %v876_v59, %s1791_s20  ;;  %v911_v50 = vmul.f32 %v904_v60, %v876_v59 }
 0x7e8   :  { %v913_v62 = vpack.c.bf16 %v912_v61, %v911_v50 }
 0x7ea   :  { %1625 = vmatmul.mubr.msk.bf16.vlgmr.msra.gmra.mrb[12].mxu1 %vm83_vm1, %v913_v62 }
 0x7eb   :  { %1648 = vmatprep.mubr.msk.bf16.mxu1 %vm1788_vm0, %v1787_v1  ;;  %1641 = vmatpush3.bf16.msra.mxu1 %v1731_v0 }
 0x7ec   :  { %1642 = vmatprep.subr.bf16.mxu1 %v1787_v1 }
 0x7ef   :  { %1643 = vmatpush3.bf16.msra.mxu1 %v1732_v2 }
 0x7f0   :  { %1644 = vmatprep.subr.bf16.mxu1 %v1787_v1 }
 0x7f3   :  { %1645 = vmatpush3.bf16.msra.mxu1 %v1733_v3 }
 0x7f4   :  { %1646 = vmatprep.subr.bf16.mxu1 %v1787_v1 }
 0x7f7   :  { %1647 = vmatpush3.bf16.msra.mxu1 %v1734_v4 }
 0x8bd   :  { %v974_v8 = vpop.f32.mrb[12].mxu1 }
 0x8be   :  { %v975_v9 = vadd.f32 %v1418_v5, %v974_v8  ;;  %v1626_v10 = vpop.f32.mrb[13].mxu1 }
 0x8bf   :  { %v977_v12 = vpop.f32.mrb[14].mxu1 }
 0x8c0   :  { %v981_v14 = vmax.f32 %v975_v9, 0.0  ;;  %v978_v15 = vadd.f32 %v1418_v5, %v977_v12  ;;  %v1627_v18 = vpop.f32.mrb[15].mxu1 }
 0x8c2   :  { %v1133_v1 = vmul.f32 %v990_v7, %v981_v14  ;;  %v982_v13 = vmax.f32 %v978_v15, 0.0 }
 0x8c4   :  { %v1135_v22 = vsel %vm133_vm2, %v1133_v1, 0.0  ;;  %v998_v23 = vpack.c.bf16 %v982_v13, %v981_v14  ;;  %v1134_v24 = vmul.f32 %v997_v16, %v982_v13 }
 0x8c5   :  { %v1136_v25 = vrot.slane %v1135_v22, 4 }
 0x8c6   :  { %v1142_v26 = vsel %vm133_vm2, %v1134_v24, 0.0  ;;  %1637 = vmatmul.mubr.msk.bf16.vlgmr.msra.gmra.mrb[12].mxu0 %vm133_vm2, %v998_v23 }
 0x8c7   :  { %v1137_v27 = vadd.f32 %v1136_v25, %v1135_v22  ;;  %v1143_v28 = vrot.slane %v1142_v26, 4  ;;  %1653 = vmatpush3.msk.msra.mxu0 %vm1261_vm9, %v1933_v17 }
 0x8c9   :  { %v1138_v29 = vrot.slane %v1137_v27, 2  ;;  %v1144_v30 = vadd.f32 %v1143_v28, %v1142_v26 }
 0x8cb   :  { %v1139_v31 = vadd.f32 %v1138_v29, %v1137_v27  ;;  %v1145_v32 = vrot.slane %v1144_v30, 2 }
 0x8cd   :  { %v1140_v33 = vrot.slane %v1139_v31, 1  ;;  %v1146_v34 = vadd.f32 %v1145_v32, %v1144_v30 }
 0x8cf   :  { %v1141_v36 = vadd.f32 %v1140_v33, %v1139_v31  ;;  %v1147_v38 = vrot.slane %v1146_v34, 1 }
 0x8d1   :  { %v1154_v40 = vmul.f32 %v1748_v35, %v1141_v36  ;;  %v1148_v41 = vadd.f32 %v1147_v38, %v1146_v34  ;;  %v1428_v38 = vld [vmem:[%s2136_s14] ss:$0 sm:$0xff]  ;;  %s1792_s14 = smov 32  }
 0x8d3   :  { %v1156_v42 = vmul.f32 %v1750_v39, %v1148_v41  ;;  %v1157_v44 = vpack.c.bf16 %v1154_v40, %v1154_v40  ;;  %v1345_v41 = vpop.permute.xlu0 %1344 }
 0x8d5   :  { %v1158_v45 = vpack.c.bf16 %v1156_v42, %v1156_v42  ;;  %v1176_v46 = vunpack.c.l.b16 %v1157_v44  ;;  %v1343_v44 = vpop.permute.xlu1 %1342 }
 0x8d7   :  { %v1177_v37 = vunpack.c.l.b16 %v1158_v45 }
 0x8d9   :  { %v1178_v47 = vrot.slane %v1177_v37, 7 }
 0x8db   :  { %v1180_v21 = vsel %vm1179_vm8, %v1178_v47, %v1176_v46 }
 0x8dc   :  { %v1181_v48 = vpack.c.b16 %v1180_v21, %v1180_v21 }
 0x8de   :  { %1649 = vmatmul.mubr.msk.bf16.vlgmr.msra.gmra.mrb[16].mxu1 %vm133_vm2, %v1181_v48 }
 0x999   :  { %v1075_v19 = vpop.f32.mrb[12].mxu0 }
 0x99a   :  { %v1076_v51 = vadd.f32 %v1422_v49, %v1075_v19  ;;  %v1638_v52 = vpop.f32.mrb[13].mxu0 }
 0x99b   :  { %v1078_v53 = vpop.f32.mrb[14].mxu0 }
 0x99c   :  { %v1088_v54 = vsel %vm1082_vm11, -1e+09, %v1076_v51  ;;  %v1079_v55 = vadd.f32 %v1422_v49, %v1078_v53  ;;  %v1639_v56 = vpop.f32.mrb[15].mxu0 }
 0x99d   :  { %v1091_v57 = vsel %vm1090_vm10, %v1088_v54, -inf }
 0x99e   :  { %v1092_v58 = vrot.slane %v1091_v57, 4  ;;  %v1089_v59 = vsel %vm1083_vm12, -1e+09, %v1079_v55 }
 0x99f   :  { %v1098_v17 = vsel %vm1090_vm10, %v1089_v59, -inf }
 0x9a0   :  { %v1093_v60 = vmax.f32 %v1091_v57, %v1092_v58  ;;  %v1099_v61 = vrot.slane %v1098_v17, 4 }
 0x9a2   :  { %v1094_v50 = vrot.slane %v1093_v60, 2  ;;  %v1100_v62 = vmax.f32 %v1098_v17, %v1099_v61 }
 0x9a4   :  { %v1095_v63 = vmax.f32 %v1093_v60, %v1094_v50  ;;  %v1101_v20 = vrot.slane %v1100_v62, 2 }
 0x9a6   :  { %v1096_v0 = vrot.slane %v1095_v63, 1  ;;  %v1102_v2 = vmax.f32 %v1100_v62, %v1101_v20 }
 0x9a8   :  { %v1097_v3 = vmax.f32 %v1095_v63, %v1096_v0  ;;  %v1103_v4 = vrot.slane %v1102_v2, 1 }
 0x9aa   :  { %v1105_v5 = vsub.f32 %v1088_v54, %v1097_v3  ;;  %v1104_v7 = vmax.f32 %v1102_v2, %v1103_v4 }
 0x9ac   :  { %v1107_v8 = vmul.f32 1.442695, %v1105_v5  ;;  %v1106_v9 = vsub.f32 %v1089_v59, %v1104_v7 }
 0x9ae   :  { %1751 = vpow2.f32 %v1107_v8  ;;  %v1109_v10 = vmul.f32 1.442695, %v1106_v9 }
 0x9b0   :  { %1753 = vpow2.f32 %v1109_v10 }
 0x9b1   :  { %v1243_v12 = vpop.f32.mrb[16].mxu1 }
 0x9b2   :  { %v1650_v14 = vpop.f32.mrb[17].mxu1  ;;  %v1244_v39 = vadd.f32 %v1428_v38, %v1243_v12 }
 0x9b3   :  { %v1246_v15 = vpop.f32.mrb[18].mxu1 }
 0x9b4   :  { %v1651_v18 = vpop.f32.mrb[19].mxu1  ;;  %v1434_v40 = vmul.f32 -1.442695, %v1244_v39 }
 0x9b8   :  { %v1752_v6 = vpop.eup %1751 }
 0x9b9   :  { %v1111_v11 = vsel %vm1090_vm10, %v1752_v6, 0.0 }
 0x9ba   :  { %v1754_v1 = vpop.eup %1753  ;;  %v1112_v13 = vrot.slane %v1111_v11, 4 }
 0x9bb   :  { %v1118_v16 = vsel %vm1090_vm10, %v1754_v1, 0.0 }
 0x9bc   :  { %v1113_v22 = vadd.f32 %v1112_v13, %v1111_v11  ;;  %v1119_v23 = vrot.slane %v1118_v16, 4 }
 0x9be   :  { %v1114_v24 = vrot.slane %v1113_v22, 2  ;;  %v1120_v25 = vadd.f32 %v1119_v23, %v1118_v16 }
 0x9c0   :  { %v1115_v26 = vadd.f32 %v1114_v24, %v1113_v22  ;;  %v1121_v27 = vrot.slane %v1120_v25, 2 }
 0x9c2   :  { %v1116_v28 = vrot.slane %v1115_v26, 1  ;;  %v1122_v29 = vadd.f32 %v1121_v27, %v1120_v25 }
 0x9c4   :  { %v1123_v30 = vrot.slane %v1122_v29, 1  ;;  %v1117_v31 = vadd.f32 %v1116_v28, %v1115_v26 }
 0x9c6   :  { %v1124_v32 = vadd.f32 %v1123_v30, %v1122_v29  ;;  %1755 = vrcp.f32 %v1117_v31 }
 0x9c8   :  { %1757 = vrcp.f32 %v1124_v32 }
 0x9c9   :  { %1759 = vpow2.f32 %v1434_v40 }
 0x9d0   :  { %v1756_v33 = vpop.eup %1755 }
 0x9d1   :  { %v1126_v34 = vmul.f32 %v1756_v33, %v1752_v6 }
 0x9d2   :  { %v1758_v35 = vpop.eup %1757 }
 0x9d3   :  { %1654 = vmatprep.mubr.msk.f32.mxu0 %vm1090_vm10, %v1126_v34  ;;  %v1128_v36 = vmul.f32 %v1758_v35, %v1754_v1  ;;  %v1760_v21 = vpop.eup %1759 }
 0x9d4   :  { %v1252_v52 = vadd.f32 1.0, %v1760_v21 }
 0x9d5   :  { %1655 = vmatmul.mubr.msk.f32.vlgmr.msra.gmra.mrb[16].mxu0 %vm1090_vm10, %v1128_v36 }
 0x9d6   :  { %1761 = vrcp.f32 %v1252_v52 }
 0x9e0   :  { %v1762_v50 = vpop.eup %1761 }
 0xaa8   :  { %v1656_v42 = vpop.f32.mrb[16].mxu0 }
 0xaa9   :  { %v1349_v45 = vmul.f32 %v1656_v42, %v1345_v41  ;;  %v1331_v37 = vpop.f32.mrb[17].mxu0 }
 0xaaa   :  { %v1348_v46 = vmul.f32 %v1343_v44, %v1331_v37 }
 0xaab   :  { %v1357_v47 = vsel %vm83_vm1, %v1349_v45, 0.0 }
 0xaac   :  { %v1358_v48 = vrot.slane %v1357_v47, 4  ;;  %v1350_v49 = vsel %vm83_vm1, %v1348_v46, 0.0 }
 0xaad   :  { %v1351_v19 = vrot.slane %v1350_v49, 4 }
 0xaae   :  { %v1359_v51 = vadd.f32 %v1358_v48, %v1357_v47 }
 0xaaf   :  { %v1352_v53 = vadd.f32 %v1351_v19, %v1350_v49 }
 0xab0   :  { %v1360_v54 = vrot.slane %v1359_v51, 2 }
 0xab1   :  { %v1353_v55 = vrot.slane %v1352_v53, 2 }
 0xab2   :  { %v1361_v56 = vadd.f32 %v1360_v54, %v1359_v51 }
 0xab3   :  { %v1354_v57 = vadd.f32 %v1353_v55, %v1352_v53 }
 0xab4   :  { %v1362_v58 = vrot.slane %v1361_v56, 1 }
 0xab5   :  { %v1355_v59 = vrot.slane %v1354_v57, 1 }
 0xab6   :  { %v1363_v17 = vadd.f32 %v1362_v58, %v1361_v56 }
 0xab7   :  { %v1356_v60 = vadd.f32 %v1355_v59, %v1354_v57 }
 0xab9   :  { %v1366_v61 = vsel %vm1179_vm8, %v1363_v17, %v1356_v60 }
 0xaba   :  { %1367 = vrot.lane.b32.xlu0 %v1366_v61, %s1792_s14 }
 0xabe   :  { %1372 = vrot.lane.b32.xlu0 %v1762_v50, %s1792_s14 }
 0xb2c   :  { %v1368_v62 = vpop.permute.xlu0 %1367 }
 0xb2d   :  { %v1370_v63 = vmul.f32 %v1368_v62, %v2040_v43 }
 0xb30   :  { %v1373_v20 = vpop.permute.xlu0 %1372 }
 0xb31   :  { %v1375_v0 = vmul.f32 %v1373_v20, %v1370_v63 }
 0xb33   :  { %1377 = vrot.lane.b32.xlu0 %v1375_v0, %s1791_s20 }
 0xba5   :  { %v1378_v2 = vpop.permute.xlu0 %1377 }
 0xba6   :  { %1381 = vst.msk [vmem:[#allocation2] sm:$0x3] %vm1380_vm13, %v1378_v2 }
 0xba7   :  { %1774 = shalt.err (!%p1771_p4)
}
 0xba8   :  { %s1775_s16 = scalar_lea.hbm %s2137_s15, 32 }
 0xba9   :  { %p1776_p5 = scmp.ne.s32.totalorder %s2137_s15, %s1775_s16  ;;  %p1779_p6 = scmp.lt.u32.totalorder %s1775_s16, %s2137_s15 }
 0xbab   :  { %p1781_p7 = pnand %p1779_p6, %p1776_p5 }
 0xbad   :  { %1784 = shalt.err (!%p1781_p7)
}
 0xbae   :  { %1391 = dma.vmem_to_hbm [thread:$0]  %s1389_s28, 32, %s2137_s15, [#allocation3]  }
 0xbaf   :  { %1785 = dma.done.wait [#allocation3], 32  }
 0xbb0   :  { %1786 = vsyncadd [#allocation3], 4294967264 }
 0xbb1   :  { %1395 = vsyncpa [#allocation3], 1 }

// kernel: tpu_custom_call.1
= control target key start
LH: loop header
LB: loop body
LE: loop exit
PB: predicated region body
PF: predicated region fallthrough
CT: control target
= control target key end

     0   :  { %v1787_v1 = vmov 0.0   ;;  %vm1788_vm0 = vmmov 0   ;;  %vm83_vm1 = vcmask 261120   ;;  %s2122_s0 = inlined_call_operand.vmem [shape: bf16[2,32], index: 0, kind: input, shape index: {}]   ;;  %s2123_s1 = inlined_call_operand.vmem [shape: bf16[2,8,32], index: 1, kind: input, shape index: {}]   ;;  %s2124_s2 = inlined_call_operand.vmem [shape: f32[2,8], index: 2, kind: input, shape index: {}]   ;;  %s2125_s3 = inlined_call_operand.vmem [shape: bf16[32,64], index: 3, kind: input, shape index: {}]   ;;  %s2126_s4 = inlined_call_operand.vmem [shape: f32[3,64], index: 4, kind: input, shape index: {}]   ;;  %s2127_s5 = inlined_call_operand.vmem [shape: bf16[32,64], index: 5, kind: input, shape index: {}]   ;;  %s2128_s6 = inlined_call_operand.vmem [shape: f32[3,64], index: 6, kind: input, shape index: {}]   ;;  %s2129_s7 = inlined_call_operand.vmem [shape: f32[64,8], index: 7, kind: input, shape index: {}]   ;;  %s2130_s8 = inlined_call_operand.vmem [shape: f32[8,64], index: 8, kind: input, shape index: {}]   ;;  %s2131_s9 = inlined_call_operand.vmem [shape: bf16[32,64], index: 9, kind: input, shape index: {}]   ;;  %s2132_s10 = inlined_call_operand.vmem [shape: f32[1,64], index: 10, kind: input, shape index: {}]   ;;  %s2133_s11 = inlined_call_operand.vmem [shape: bf16[64,4], index: 11, kind: input, shape index: {}]   ;;  %s2134_s12 = inlined_call_operand.vmem [shape: f32[1,4], index: 12, kind: input, shape index: {}]   ;;  %s2135_s13 = inlined_call_operand.vmem [shape: bf16[64,32], index: 13, kind: input, shape index: {}]   ;;  %s2136_s14 = inlined_call_operand.vmem [shape: f32[1,32], index: 14, kind: input, shape index: {}]   ;;  %s2137_s15 = inlined_call_operand.hbm [shape: f32[2,32], index: 15, kind: output, shape index: {}]  }
   0x1   :  { %v1720_v0 = vld [vmem:[%s2125_s3] sm:$0xff]   ;;  %1508 = vmatprep.subr.bf16.mxu0 %v1787_v1  ;;  %v1721_v2 = vld [vmem:[%s2125_s3 + $0x8] sm:$0xff]   ;;  %1512 = vmatprep.mubr.msk.bf16.mxu0 %vm1788_vm0, %v1787_v1 }
   0x2   :  { %1509 = vmatpush3.bf16.msra.mxu0 %v1720_v0  ;;  %1532 = vmatprep.mubr.msk.f32.mxu1 %vm1788_vm0, %v1787_v1  ;;  %v61_v3 = vld [vmem:[%s2122_s0] sm:$0x1] }
   0x3   :  { %1510 = vmatprep.subr.bf16.mxu0 %v1787_v1 }
   0x6   :  { %1511 = vmatpush3.bf16.msra.mxu0 %v1721_v2 }
   0x7   :  { %1535 = vmatprep.subr.mxu0 %v1787_v1 }
   0x9   :  { %1513 = vmatmul.mubr.msk.bf16.vlgmr.msra.gmra.mrb[0].mxu0 %vm83_vm1, %v61_v3 }
   0xa   :  { %1537 = vmatprep.mubr.msk.f32.mxu0 %vm1788_vm0, %v1787_v1 }
   0xb   :  { %20 = vsyncpa [#allocation3], 0  ;;  %v52_v4 = vld [vmem:[%s2129_s7] sm:$0xff]  ;;  %v53_v5 = vld [vmem:[%s2129_s7 + $0x8] sm:$0xff]  ;;  %v1789_v7 = vmov 0.0|0.0   ;;  %v67_v18 = vlaneseq  ;;  %vm133_vm2 = vcmask 523264  }
   0xc   :  { %v1899_v6 = vpack.c.bf16 %v53_v5, %v52_v4  ;;  %1657 = vmatprep.subr.bf16.mxu1 %v1789_v7  ;;  %v54_v8 = vld [vmem:[%s2129_s7 + $0x10] sm:$0xff]  ;;  %v55_v9 = vld [vmem:[%s2129_s7 + $0x18] sm:$0xff]  ;;  %v56_v10 = vld [vmem:[%s2129_s7 + $0x20] sm:$0xff]  ;;  %vm208_vm4 = vcmask 64512   ;;  %vm1129_vm7 = vcmask 58368   ;;  %s1791_s20 = smov 96  }
   0xd   :  { %v1911_v11 = vpack.c.bf16 %v55_v9, %v54_v8  ;;  %v57_v12 = vld [vmem:[%s2129_s7 + $0x28] sm:$0xff]  ;;  %v58_v14 = vld [vmem:[%s2129_s7 + $0x30] sm:$0xff]  ;;  %v59_v15 = vld [vmem:[%s2129_s7 + $0x38] sm:$0xff]  ;;  %v1936_v19 = vshrl.u32 %v67_v18, 7  ;;  %vm1179_vm8 = vcmask 1041409   ;;  %vm1261_vm9 = vcmask 1043456  }
   0xe   :  { %1659 = vmatpush3.bf16.msra.mxu1 %v1899_v6  ;;  %v1917_v13 = vpack.c.bf16 %v57_v12, %v56_v10  ;;  %v1926_v16 = vpack.c.bf16 %v59_v15, %v58_v14  ;;  %v1933_v17 = vld [vmem:[%s2130_s8] sm:$0xff]  ;;  %v1723_v46 = vld [vmem:[%s2127_s5 + $0x8] sm:$0xff]   ;;  %vm1090_vm10 = vcmask 31744   ;;  %vm1380_vm13 = vcmask 254976  }
   0xf   :  { %1660 = vmatprep.subr.bf16.mxu1 %v1789_v7  ;;  %1536 = vmatpush3.msra.mxu0 %v1933_v17  ;;  %v1939_v20 = vsub.s32 0, %v1936_v19  ;;  %v1944_v21 = vld [vmem:[%s2126_s4] sm:$0x7] }
  0x10   :  { %1669 = vmatprep.subr.bf16.mxu0 %v1789_v7  ;;  %v1722_v44 = vld [vmem:[%s2127_s5] sm:$0xff]  }
  0x11   :  { %v70_v22 = vrot.slane %v1944_v21, %v1939_v20  ;;  %v1724_v47 = vld [vmem:[%s2123_s1] sm:$0xff]  }
  0x12   :  { %1662 = vmatpush3.bf16.msra.mxu1 %v1911_v11  ;;  %v1996_v50 = vld [vmem:[%s2128_s6] sm:$0x7]  ;;  %s1793_s6 = smov [#allocation2]  }
  0x13   :  { %1663 = vmatprep.subr.bf16.mxu1 %v1789_v7  ;;  %v454_v51 = vrot.slane %v1996_v50, %v1939_v20  ;;  %s1388_s28 = sshll.u32 %s1793_s6, 4  ;;  %s1389_s28 = int_to_ptr.vmem [resolvable:$true] %s1388_s28 }
  0x14   :  { %p1768_p1 = scmp.lt.s32.totalorder %s1389_s28, %s1389_s28 }
  0x16   :  { %1665 = vmatpush3.bf16.msra.mxu1 %v1917_v13 }
  0x17   :  { %1666 = vmatprep.subr.bf16.mxu1 %v1789_v7 }
  0x1a   :  { %1668 = vmatpush3.bf16.msra.mxu1 %v1926_v16 }
  0x1b   :  { %1559 = vmatprep.subr.mxu1 %v1787_v1 }
  0xdc   :  { %v121_v23 = vpop.f32.mrb[0].mxu0 }
  0xdd   :  { %v122_v24 = vadd.f32 %v121_v23, %v70_v22  ;;  %v1514_v25 = vpop.f32.mrb[1].mxu0 }
  0xde   :  { %v124_v26 = vpop.f32.mrb[2].mxu0 }
  0xdf   :  { %v128_v27 = vmin.f32 %v122_v24, 0.0  ;;  %v1515_v28 = vpop.f32.mrb[3].mxu0  ;;  %vm127_vm3 = vcmp.gt.f32.partialorder %v122_v24, 0.0 }
  0xe1   :  { %v129_v29 = vmul.f32 1.442695, %v128_v27 }
  0xe3   :  { %1735 = vpow2.f32 %v129_v29 }
  0xed   :  { %v1736_v30 = vpop.eup %1735 }
  0xee   :  { %v1399_v31 = vadd.f32 -1.0, %v1736_v30  ;;  %v436_v30 = vsub.s32 1, %v1936_v19 }
  0xf0   :  { %v132_v32 = vsel %vm127_vm3, %v122_v24, %v1399_v31 }
  0xf1   :  { %1533 = vmatmul.mubr.msk.f32.vlgmr.msra.gmra.mrb[0].mxu1 %vm133_vm2, %v132_v32 }
  0xf2   :  { %1560 = vmatpush3.msra.mxu1 %v1933_v17  ;;  %1561 = vmatprep.mubr.msk.f32.mxu1 %vm1788_vm0, %v1787_v1 }
  0xf3   :  { %1564 = vmatprep.subr.bf16.mxu1 %v1787_v1 }
 0x1c4   :  { %v203_v33 = vpop.f32.mrb[0].mxu1 }
 0x1c5   :  { %v207_v34 = vmul.f32 0.125, %v203_v33  ;;  %v1534_v35 = vpop.f32.mrb[1].mxu1  ;;  %v1726_v33 = vld [vmem:[%s2131_s9 + $0x8] sm:$0xff]  }
 0x1c6   :  { %v437_v35 = vrot.slane %v1944_v21, %v436_v30 }
 0x1c7   :  { %1538 = vmatmul.mubr.msk.f32.vlgmr.msra.gmra.mrb[4].mxu0 %vm208_vm4, %v207_v34 }
 0x1c8   :  { %1671 = vmatpush3.bf16.msra.mxu0 %v1899_v6  ;;  %1556 = vmatprep.mubr.msk.f32.mxu0 %vm1788_vm0, %v1787_v1 }
 0x1c9   :  { %1672 = vmatprep.subr.bf16.mxu0 %v1789_v7 }
 0x1cc   :  { %1674 = vmatpush3.bf16.msra.mxu0 %v1911_v11 }
 0x1cd   :  { %1675 = vmatprep.subr.bf16.mxu0 %v1789_v7 }
 0x1d0   :  { %1677 = vmatpush3.bf16.msra.mxu0 %v1917_v13 }
 0x1d1   :  { %1678 = vmatprep.subr.bf16.mxu0 %v1789_v7 }
 0x1d4   :  { %1680 = vmatpush3.bf16.msra.mxu0 %v1926_v16 }
 0x1d5   :  { %1591 = vmatprep.subr.mxu0 %v1933_v17 }
 0x29a   :  { %v278_v36 = vpop.f32.mrb[4].mxu0 }
 0x29b   :  { %v1961_v37 = vsub.f32 %v132_v32, %v278_v36  ;;  %v1539_v38 = vpop.f32.mrb[5].mxu0  ;;  %v1725_v32 = vld [vmem:[%s2131_s9] sm:$0xff]   ;;  %v441_v36 = vsub.s32 2, %v1936_v19 }
 0x29c   :  { %v1790_v38 = vmov 1966171168  }
 0x29d   :  { %v283_v39 = vmul.f32 %v1961_v37, %v1961_v37 }
 0x29f   :  { %1557 = vmatmul.mubr.msk.f32.vlgmr.msra.gmra.mrb[6].mxu0 %vm133_vm2, %v283_v39  ;;  %v880_v39 = vunpack.c.l.s4 %v1790_v38 }
 0x2a0   :  { %1592 = vmatpush3.msra.mxu0 %v1933_v17 }
 0x2a1   :  { %1698 = vmatprep.subr.bf16.mxu0 %v1899_v6 }
 0x372   :  { %v353_v40 = vpop.f32.mrb[6].mxu0 }
 0x373   :  { %v357_v41 = vmul.f32 0.125, %v353_v40  ;;  %v1558_v42 = vpop.f32.mrb[7].mxu0 }
 0x374   :  { %v881_v42 = vunpack.c.0.s8 %v880_v39 }
 0x375   :  { %v358_v43 = vadd.f32 1e-05, %v357_v41  ;;  %v442_v41 = vrot.slane %v1944_v21, %v441_v36  ;;  %v869_v21 = vrot.slane %v1996_v50, %v436_v30 }
 0x377   :  { %1737 = vrsqrt.f32 %v358_v43 }
 0x381   :  { %v1738_v45 = vpop.eup %1737 }
 0x382   :  { %1562 = vmatmul.mubr.msk.f32.vlgmr.msra.gmra.mrb[2].mxu1 %vm208_vm4, %v1738_v45 }
 0x383   :  { %1565 = vmatpush3.bf16.msra.mxu1 %v1722_v44  ;;  %1568 = vmatprep.mubr.msk.bf16.mxu1 %vm1788_vm0, %v1787_v1  ;;  %v884_v44 = vsub.s32 %v881_v42, %v1936_v19 }
 0x384   :  { %1566 = vmatprep.subr.bf16.mxu1 %v1787_v1 }
 0x387   :  { %1567 = vmatpush3.bf16.msra.mxu1 %v1723_v46  ;;  %v1728_v46 = vld [vmem:[%s2133_s11 + $0x8] sm:$0xff]  }
 0x388   :  { %1682 = vmatprep.subr.bf16.mxu1 %v1899_v6 }
 0x38a   :  { %1569 = vmatmul.mubr.msk.bf16.vlgmr.msra.gmra.mrb[4].mxu1 %vm83_vm1, %v1724_v47 }
 0x38b   :  { %1684 = vmatpush3.bf16.msra.mxu1 %v1899_v6 }
 0x38c   :  { %1686 = vmatprep.subr.bf16.mxu1 %v1911_v11 }
 0x38f   :  { %1688 = vmatpush3.bf16.msra.mxu1 %v1911_v11 }
 0x390   :  { %1690 = vmatprep.subr.bf16.mxu1 %v1917_v13 }
 0x393   :  { %1692 = vmatpush3.bf16.msra.mxu1 %v1917_v13 }
 0x394   :  { %1694 = vmatprep.subr.bf16.mxu1 %v1926_v16 }
 0x397   :  { %1696 = vmatpush3.bf16.msra.mxu1 %v1926_v16 }
 0x398   :  { %1615 = vmatprep.subr.mxu1 %v1933_v17 }
 0x455   :  { %v1991_v48 = vpop.f32.mrb[2].mxu1 }
 0x456   :  { %v1563_v49 = vpop.f32.mrb[3].mxu1  ;;  %v433_v34 = vmul.f32 %v1991_v48, %v1961_v37  ;;  %v1727_v37 = vld [vmem:[%s2133_s11] sm:$0xff]  }
 0x458   :  { %v438_v40 = vmul.f32 %v437_v35, %v433_v34 }
 0x45a   :  { %v2040_v43 = vadd.f32 %v442_v41, %v438_v40 }
 0x45c   :  { %v885_v45 = vrot.slane %v2040_v43, %v884_v44 }
 0x45d   :  { %v509_v52 = vpop.f32.mrb[4].mxu1 }
 0x45e   :  { %v510_v53 = vadd.f32 %v509_v52, %v454_v51  ;;  %v1570_v54 = vpop.f32.mrb[5].mxu1  ;;  %v886_v47 = vcombine.high %v885_v45, %v885_v45 }
 0x45f   :  { %v512_v55 = vpop.f32.mrb[6].mxu1 }
 0x460   :  { %v518_v56 = vmin.f32 %v510_v53, 0.0  ;;  %v513_v57 = vadd.f32 %v512_v55, %v454_v51  ;;  %v1571_v58 = vpop.f32.mrb[7].mxu1  ;;  %vm516_vm5 = vcmp.gt.f32.partialorder %v510_v53, 0.0  ;;  %v875_v51 = vrot.slane %v1996_v50, %v441_v36 }
 0x461   :  { %v900_v52 = vrot.slane %v886_v47, %v884_v44 }
 0x462   :  { %v520_v59 = vmul.f32 1.442695, %v518_v56  ;;  %v519_v60 = vmin.f32 %v513_v57, 0.0  ;;  %vm517_vm6 = vcmp.gt.f32.partialorder %v513_v57, 0.0 }
 0x463   :  { %v908_v58 = vrot.slane %v900_v52, %v1939_v20 }
 0x464   :  { %1739 = vpow2.f32 %v520_v59  ;;  %v522_v61 = vmul.f32 1.442695, %v519_v60 }
 0x466   :  { %1741 = vpow2.f32 %v522_v61 }
 0x46e   :  { %v1740_v62 = vpop.eup %1739 }
 0x46f   :  { %v1408_v63 = vadd.f32 -1.0, %v1740_v62 }
 0x470   :  { %v1742_v0 = vpop.eup %1741 }
 0x471   :  { %v1409_v2 = vadd.f32 -1.0, %v1742_v0  ;;  %v526_v3 = vsel %vm516_vm5, %v510_v53, %v1408_v63  ;;  %v893_v53 = vrot.slane %v885_v45, %v884_v44  ;;  %v1729_v63 = vld [vmem:[%s2133_s11 + $0x10] sm:$0xff]   ;;  %v1731_v0 = vld [vmem:[%s2135_s13] sm:$0xff]  }
 0x472   :  { %1588 = vmatprep.mubr.msk.f32.mxu1 %vm133_vm2, %v526_v3 }
 0x473   :  { %v527_v4 = vsel %vm517_vm6, %v513_v57, %v1409_v2  ;;  %v904_v60 = vrot.slane %v893_v53, %v1939_v20  ;;  %v1732_v2 = vld [vmem:[%s2135_s13 + $0x8] sm:$0xff]  }
 0x474   :  { %1589 = vmatmul.mubr.msk.f32.vlgmr.msra.gmra.mrb[8].mxu1 %vm133_vm2, %v527_v4 }
 0x475   :  { %1616 = vmatpush3.msra.mxu1 %v1933_v17 }
 0x476   :  { %1620 = vmatprep.subr.bf16.mxu1 %v1787_v1 }
 0x547   :  { %v1590_v5 = vpop.f32.mrb[8].mxu1 }
 0x548   :  { %v600_v7 = vpop.f32.mrb[9].mxu1  ;;  %v610_v9 = vmul.f32 0.125, %v1590_v5  ;;  %v1418_v5 = vld [vmem:[%s2132_s10] ss:$0 sm:$0xff] }
 0x549   :  { %v609_v8 = vmul.f32 0.125, %v600_v7 }
 0x54b   :  { %1593 = vmatprep.mubr.msk.f32.mxu0 %vm208_vm4, %v609_v8 }
 0x54c   :  { %1594 = vmatmul.mubr.msk.f32.vlgmr.msra.gmra.mrb[8].mxu0 %vm208_vm4, %v610_v9 }
 0x54d   :  { %1700 = vmatpush3.bf16.msra.mxu0 %v1899_v6 }
 0x54e   :  { %1702 = vmatprep.subr.bf16.mxu0 %v1911_v11 }
 0x551   :  { %1704 = vmatpush3.bf16.msra.mxu0 %v1911_v11  ;;  %v983_v11 = vld [vmem:[%s2124_s2] sm:$0x3]  ;;  %s1763_s2 = scalar_lea.vmem %s1389_s28, 32 }
 0x552   :  { %1706 = vmatprep.subr.bf16.mxu0 %v1917_v13  ;;  %v994_v31 = vrot.slane %v983_v11, %v436_v30  ;;  %p1764_p0 = scmp.ne.s32.totalorder %s1389_s28, %s1763_s2  ;;  %p1769_p2 = scmp.lt.s32.totalorder %s1763_s2, %s1763_s2 }
 0x554   :  { %p1770_p3 = por %p1769_p2, %p1768_p1 }
 0x555   :  { %1708 = vmatpush3.bf16.msra.mxu0 %v1917_v13  ;;  %v1130_v13 = vsel %vm1129_vm7, %v983_v11, 0.0 }
 0x556   :  { %1710 = vmatprep.subr.bf16.mxu0 %v1926_v16  ;;  %1131 = vadd.xlane.f32.xlu1 %v1130_v13  ;;  %p1771_p4 = pnand %p1770_p3, %p1764_p0 }
 0x559   :  { %1712 = vmatpush3.bf16.msra.mxu0 %v1926_v16  ;;  %v987_v16 = vrot.slane %v983_v11, %v1939_v20  ;;  %v1730_v20 = vld [vmem:[%s2133_s11 + $0x18] sm:$0xff]  }
 0x55a   :  { %1628 = vmatprep.subr.bf16.mxu0 %v1787_v1 }
 0x55b   :  { %989 = vbcast.lane.b32.xlu0 %v987_v16, 256 }
 0x55f   :  { %996 = vbcast.lane.b32.xlu0 %v994_v31, 256 }
 0x5cd   :  { %v990_v7 = vpop.permute.xlu0 %989 }
 0x5ce   :  { %vm1082_vm11 = vcmp.eq.f32.partialorder %v990_v7, 0.0 }
 0x5d1   :  { %v997_v16 = vpop.permute.xlu0 %996 }
 0x5d2   :  { %vm1083_vm12 = vcmp.eq.f32.partialorder %v997_v16, 0.0 }
 0x61f   :  { %v1595_v10 = vpop.f32.mrb[8].mxu0 }
 0x620   :  { %v693_v12 = vsub.f32 %v527_v4, %v1595_v10  ;;  %v683_v14 = vpop.f32.mrb[9].mxu0  ;;  %v1734_v4 = vld [vmem:[%s2135_s13 + $0x18] sm:$0xff]  }
 0x621   :  { %v692_v15 = vsub.f32 %v526_v3, %v683_v14  ;;  %v1733_v3 = vld [vmem:[%s2135_s13 + $0x10] sm:$0xff]  }
 0x622   :  { %v695_v6 = vmul.f32 %v693_v12, %v693_v12 }
 0x623   :  { %v694_v18 = vmul.f32 %v692_v15, %v692_v15 }
 0x625   :  { %1612 = vmatprep.mubr.msk.f32.mxu0 %vm133_vm2, %v694_v18 }
 0x626   :  { %1613 = vmatmul.mubr.msk.f32.vlgmr.msra.gmra.mrb[10].mxu0 %vm133_vm2, %v695_v6  ;;  %v1132_v6 = vpop.xlane.xlu1 %1131 }
 0x627   :  { %1636 = vmatprep.mubr.msk.bf16.mxu0 %vm1788_vm0, %v1787_v1  ;;  %1629 = vmatpush3.bf16.msra.mxu0 %v1727_v37  ;;  %v1150_v11 = vrot.slane %v1132_v6, 1 }
 0x628   :  { %1630 = vmatprep.subr.bf16.mxu0 %v1787_v1 }
 0x62b   :  { %1631 = vmatpush3.bf16.msra.mxu0 %v1728_v46 }
 0x62c   :  { %1632 = vmatprep.subr.bf16.mxu0 %v1787_v1 }
 0x62f   :  { %1633 = vmatpush3.bf16.msra.mxu0 %v1729_v63 }
 0x630   :  { %1634 = vmatprep.subr.bf16.mxu0 %v1787_v1 }
 0x633   :  { %1635 = vmatpush3.bf16.msra.mxu0 %v1730_v20 }
 0x634   :  { %1652 = vmatprep.subr.msk.mxu0 %vm1261_vm9, %v1933_v17 }
 0x6f9   :  { %v1614_v22 = vpop.f32.mrb[10].mxu0 }
 0x6fa   :  { %v778_v23 = vmul.f32 0.125, %v1614_v22  ;;  %v768_v24 = vpop.f32.mrb[11].mxu0 }
 0x6fb   :  { %v777_v25 = vmul.f32 0.125, %v768_v24 }
 0x6fc   :  { %v780_v26 = vadd.f32 1e-05, %v778_v23 }
 0x6fd   :  { %v779_v27 = vadd.f32 1e-05, %v777_v25 }
 0x6ff   :  { %1743 = vrsqrt.f32 %v779_v27 }
 0x700   :  { %1745 = vrsqrt.f32 %v780_v26 }
 0x701   :  { %1747 = vrcp.f32 %v1132_v6 }
 0x702   :  { %1749 = vrcp.f32 %v1150_v11 }
 0x709   :  { %v1744_v28 = vpop.eup %1743 }
 0x70a   :  { %v1746_v29 = vpop.eup %1745  ;;  %1617 = vmatprep.mubr.msk.f32.mxu1 %vm208_vm4, %v1744_v28 }
 0x70b   :  { %1618 = vmatmul.mubr.msk.f32.vlgmr.msra.gmra.mrb[10].mxu1 %vm208_vm4, %v1746_v29  ;;  %v1748_v35 = vpop.eup %1747 }
 0x70c   :  { %1624 = vmatprep.mubr.msk.bf16.mxu1 %vm1788_vm0, %v1787_v1  ;;  %1621 = vmatpush3.bf16.msra.mxu1 %v1725_v32  ;;  %v1750_v39 = vpop.eup %1749 }
 0x70d   :  { %1622 = vmatprep.subr.bf16.mxu1 %v1787_v1 }
 0x710   :  { %1623 = vmatpush3.bf16.msra.mxu1 %v1726_v33 }
 0x711   :  { %1640 = vmatprep.subr.bf16.mxu1 %v1787_v1 }
 0x7de   :  { %v1619_v48 = vpop.f32.mrb[10].mxu1 }
 0x7df   :  { %v865_v49 = vmul.f32 %v1619_v48, %v693_v12  ;;  %v855_v19 = vpop.f32.mrb[11].mxu1 }
 0x7e0   :  { %v864_v54 = vmul.f32 %v855_v19, %v692_v15 }
 0x7e1   :  { %v871_v55 = vmul.f32 %v869_v21, %v865_v49  ;;  %v1422_v49 = vld [vmem:[%s2134_s12] ss:$0 sm:$0xff] }
 0x7e2   :  { %v870_v56 = vmul.f32 %v869_v21, %v864_v54 }
 0x7e3   :  { %v877_v57 = vadd.f32 %v875_v51, %v871_v55 }
 0x7e4   :  { %v876_v59 = vadd.f32 %v875_v51, %v870_v56 }
 0x7e5   :  { %1344 = vrot.lane.b32.xlu0 %v877_v57, %s1791_s20  ;;  %v912_v61 = vmul.f32 %v908_v58, %v877_v57 }
 0x7e6   :  { %1342 = vrot.lane.b32.xlu1 %v876_v59, %s1791_s20  ;;  %v911_v50 = vmul.f32 %v904_v60, %v876_v59 }
 0x7e8   :  { %v913_v62 = vpack.c.bf16 %v912_v61, %v911_v50 }
 0x7ea   :  { %1625 = vmatmul.mubr.msk.bf16.vlgmr.msra.gmra.mrb[12].mxu1 %vm83_vm1, %v913_v62 }
 0x7eb   :  { %1648 = vmatprep.mubr.msk.bf16.mxu1 %vm1788_vm0, %v1787_v1  ;;  %1641 = vmatpush3.bf16.msra.mxu1 %v1731_v0 }
 0x7ec   :  { %1642 = vmatprep.subr.bf16.mxu1 %v1787_v1 }
 0x7ef   :  { %1643 = vmatpush3.bf16.msra.mxu1 %v1732_v2 }
 0x7f0   :  { %1644 = vmatprep.subr.bf16.mxu1 %v1787_v1 }
 0x7f3   :  { %1645 = vmatpush3.bf16.msra.mxu1 %v1733_v3 }
 0x7f4   :  { %1646 = vmatprep.subr.bf16.mxu1 %v1787_v1 }
 0x7f7   :  { %1647 = vmatpush3.bf16.msra.mxu1 %v1734_v4 }
 0x8bd   :  { %v974_v8 = vpop.f32.mrb[12].mxu1 }
 0x8be   :  { %v975_v9 = vadd.f32 %v1418_v5, %v974_v8  ;;  %v1626_v10 = vpop.f32.mrb[13].mxu1 }
 0x8bf   :  { %v977_v12 = vpop.f32.mrb[14].mxu1 }
 0x8c0   :  { %v981_v14 = vmax.f32 %v975_v9, 0.0  ;;  %v978_v15 = vadd.f32 %v1418_v5, %v977_v12  ;;  %v1627_v18 = vpop.f32.mrb[15].mxu1 }
 0x8c2   :  { %v1133_v1 = vmul.f32 %v990_v7, %v981_v14  ;;  %v982_v13 = vmax.f32 %v978_v15, 0.0 }
 0x8c4   :  { %v1135_v22 = vsel %vm133_vm2, %v1133_v1, 0.0  ;;  %v998_v23 = vpack.c.bf16 %v982_v13, %v981_v14  ;;  %v1134_v24 = vmul.f32 %v997_v16, %v982_v13 }
 0x8c5   :  { %v1136_v25 = vrot.slane %v1135_v22, 4 }
 0x8c6   :  { %v1142_v26 = vsel %vm133_vm2, %v1134_v24, 0.0  ;;  %1637 = vmatmul.mubr.msk.bf16.vlgmr.msra.gmra.mrb[12].mxu0 %vm133_vm2, %v998_v23 }
 0x8c7   :  { %v1137_v27 = vadd.f32 %v1136_v25, %v1135_v22  ;;  %v1143_v28 = vrot.slane %v1142_v26, 4  ;;  %1653 = vmatpush3.msk.msra.mxu0 %vm1261_vm9, %v1933_v17 }
 0x8c9   :  { %v1138_v29 = vrot.slane %v1137_v27, 2  ;;  %v1144_v30 = vadd.f32 %v1143_v28, %v1142_v26 }
 0x8cb   :  { %v1139_v31 = vadd.f32 %v1138_v29, %v1137_v27  ;;  %v1145_v32 = vrot.slane %v1144_v30, 2 }
 0x8cd   :  { %v1140_v33 = vrot.slane %v1139_v31, 1  ;;  %v1146_v34 = vadd.f32 %v1145_v32, %v1144_v30 }
 0x8cf   :  { %v1141_v36 = vadd.f32 %v1140_v33, %v1139_v31  ;;  %v1147_v38 = vrot.slane %v1146_v34, 1 }
 0x8d1   :  { %v1154_v40 = vmul.f32 %v1748_v35, %v1141_v36  ;;  %v1148_v41 = vadd.f32 %v1147_v38, %v1146_v34  ;;  %v1428_v38 = vld [vmem:[%s2136_s14] ss:$0 sm:$0xff]  ;;  %s1792_s14 = smov 32  }
 0x8d3   :  { %v1156_v42 = vmul.f32 %v1750_v39, %v1148_v41  ;;  %v1157_v44 = vpack.c.bf16 %v1154_v40, %v1154_v40  ;;  %v1345_v41 = vpop.permute.xlu0 %1344 }
 0x8d5   :  { %v1158_v45 = vpack.c.bf16 %v1156_v42, %v1156_v42  ;;  %v1176_v46 = vunpack.c.l.b16 %v1157_v44  ;;  %v1343_v44 = vpop.permute.xlu1 %1342 }
 0x8d7   :  { %v1177_v37 = vunpack.c.l.b16 %v1158_v45 }
 0x8d9   :  { %v1178_v47 = vrot.slane %v1177_v37, 7 }
 0x8db   :  { %v1180_v21 = vsel %vm1179_vm8, %v1178_v47, %v1176_v46 }
 0x8dc   :  { %v1181_v48 = vpack.c.b16 %v1180_v21, %v1180_v21 }
 0x8de   :  { %1649 = vmatmul.mubr.msk.bf16.vlgmr.msra.gmra.mrb[16].mxu1 %vm133_vm2, %v1181_v48 }
 0x999   :  { %v1075_v19 = vpop.f32.mrb[12].mxu0 }
 0x99a   :  { %v1076_v51 = vadd.f32 %v1422_v49, %v1075_v19  ;;  %v1638_v52 = vpop.f32.mrb[13].mxu0 }
 0x99b   :  { %v1078_v53 = vpop.f32.mrb[14].mxu0 }
 0x99c   :  { %v1088_v54 = vsel %vm1082_vm11, -1e+09, %v1076_v51  ;;  %v1079_v55 = vadd.f32 %v1422_v49, %v1078_v53  ;;  %v1639_v56 = vpop.f32.mrb[15].mxu0 }
 0x99d   :  { %v1091_v57 = vsel %vm1090_vm10, %v1088_v54, -inf }
 0x99e   :  { %v1092_v58 = vrot.slane %v1091_v57, 4  ;;  %v1089_v59 = vsel %vm1083_vm12, -1e+09, %v1079_v55 }
 0x99f   :  { %v1098_v17 = vsel %vm1090_vm10, %v1089_v59, -inf }
 0x9a0   :  { %v1093_v60 = vmax.f32 %v1091_v57, %v1092_v58  ;;  %v1099_v61 = vrot.slane %v1098_v17, 4 }
 0x9a2   :  { %v1094_v50 = vrot.slane %v1093_v60, 2  ;;  %v1100_v62 = vmax.f32 %v1098_v17, %v1099_v61 }
 0x9a4   :  { %v1095_v63 = vmax.f32 %v1093_v60, %v1094_v50  ;;  %v1101_v20 = vrot.slane %v1100_v62, 2 }
 0x9a6   :  { %v1096_v0 = vrot.slane %v1095_v63, 1  ;;  %v1102_v2 = vmax.f32 %v1100_v62, %v1101_v20 }
 0x9a8   :  { %v1097_v3 = vmax.f32 %v1095_v63, %v1096_v0  ;;  %v1103_v4 = vrot.slane %v1102_v2, 1 }
 0x9aa   :  { %v1105_v5 = vsub.f32 %v1088_v54, %v1097_v3  ;;  %v1104_v7 = vmax.f32 %v1102_v2, %v1103_v4 }
 0x9ac   :  { %v1107_v8 = vmul.f32 1.442695, %v1105_v5  ;;  %v1106_v9 = vsub.f32 %v1089_v59, %v1104_v7 }
 0x9ae   :  { %1751 = vpow2.f32 %v1107_v8  ;;  %v1109_v10 = vmul.f32 1.442695, %v1106_v9 }
 0x9b0   :  { %1753 = vpow2.f32 %v1109_v10 }
 0x9b1   :  { %v1243_v12 = vpop.f32.mrb[16].mxu1 }
 0x9b2   :  { %v1650_v14 = vpop.f32.mrb[17].mxu1  ;;  %v1244_v39 = vadd.f32 %v1428_v38, %v1243_v12 }
 0x9b3   :  { %v1246_v15 = vpop.f32.mrb[18].mxu1 }
 0x9b4   :  { %v1651_v18 = vpop.f32.mrb[19].mxu1  ;;  %v1434_v40 = vmul.f32 -1.442695, %v1244_v39 }
 0x9b8   :  { %v1752_v6 = vpop.eup %1751 }
 0x9b9   :  { %v1111_v11 = vsel %vm1090_vm10, %v1752_v6, 0.0 }
 0x9ba   :  { %v1754_v1 = vpop.eup %1753  ;;  %v1112_v13 = vrot.slane %v1111_v11, 4 }
 0x9bb   :  { %v1118_v16 = vsel %vm1090_vm10, %v1754_v1, 0.0 }
 0x9bc   :  { %v1113_v22 = vadd.f32 %v1112_v13, %v1111_v11  ;;  %v1119_v23 = vrot.slane %v1118_v16, 4 }
 0x9be   :  { %v1114_v24 = vrot.slane %v1113_v22, 2  ;;  %v1120_v25 = vadd.f32 %v1119_v23, %v1118_v16 }
 0x9c0   :  { %v1115_v26 = vadd.f32 %v1114_v24, %v1113_v22  ;;  %v1121_v27 = vrot.slane %v1120_v25, 2 }
 0x9c2   :  { %v1116_v28 = vrot.slane %v1115_v26, 1  ;;  %v1122_v29 = vadd.f32 %v1121_v27, %v1120_v25 }
 0x9c4   :  { %v1123_v30 = vrot.slane %v1122_v29, 1  ;;  %v1117_v31 = vadd.f32 %v1116_v28, %v1115_v26 }
 0x9c6   :  { %v1124_v32 = vadd.f32 %v1123_v30, %v1122_v29  ;;  %1755 = vrcp.f32 %v1117_v31 }
 0x9c8   :  { %1757 = vrcp.f32 %v1124_v32 }
 0x9c9   :  { %1759 = vpow2.f32 %v1434_v40 }
 0x9d0   :  { %v1756_v33 = vpop.eup %1755 }
 0x9d1   :  { %v1126_v34 = vmul.f32 %v1756_v33, %v1752_v6 }
 0x9d2   :  { %v1758_v35 = vpop.eup %1757 }
 0x9d3   :  { %1654 = vmatprep.mubr.msk.f32.mxu0 %vm1090_vm10, %v1126_v34  ;;  %v1128_v36 = vmul.f32 %v1758_v35, %v1754_v1  ;;  %v1760_v21 = vpop.eup %1759 }
 0x9d4   :  { %v1252_v52 = vadd.f32 1.0, %v1760_v21 }
 0x9d5   :  { %1655 = vmatmul.mubr.msk.f32.vlgmr.msra.gmra.mrb[16].mxu0 %vm1090_vm10, %v1128_v36 }
 0x9d6   :  { %1761 = vrcp.f32 %v1252_v52 }
 0x9e0   :  { %v1762_v50 = vpop.eup %1761 }
 0xaa8   :  { %v1656_v42 = vpop.f32.mrb[16].mxu0 }
 0xaa9   :  { %v1349_v45 = vmul.f32 %v1656_v42, %v1345_v41  ;;  %v1331_v37 = vpop.f32.mrb[17].mxu0 }
 0xaaa   :  { %v1348_v46 = vmul.f32 %v1343_v44, %v1331_v37 }
 0xaab   :  { %v1357_v47 = vsel %vm83_vm1, %v1349_v45, 0.0 }
 0xaac   :  { %v1358_v48 = vrot.slane %v1357_v47, 4  ;;  %v1350_v49 = vsel %vm83_vm1, %v1348_v46, 0.0 }
 0xaad   :  { %v1351_v19 = vrot.slane %v1350_v49, 4 }
 0xaae   :  { %v1359_v51 = vadd.f32 %v1358_v48, %v1357_v47 }
 0xaaf   :  { %v1352_v53 = vadd.f32 %v1351_v19, %v1350_v49 }
 0xab0   :  { %v1360_v54 = vrot.slane %v1359_v51, 2 }
 0xab1   :  { %v1353_v55 = vrot.slane %v1352_v53, 2 }
 0xab2   :  { %v1361_v56 = vadd.f32 %v1360_v54, %v1359_v51 }
 0xab3   :  { %v1354_v57 = vadd.f32 %v1353_v55, %v1352_v53 }
 0xab4   :  { %v1362_v58 = vrot.slane %v1361_v56, 1 }
 0xab5   :  { %v1355_v59 = vrot.slane %v1354_v57, 1 }
 0xab6   :  { %v1363_v17 = vadd.f32 %v1362_v58, %v1361_v56 }
 0xab7   :  { %v1356_v60 = vadd.f32 %v1355_v59, %v1354_v57 }
 0xab9   :  { %v1366_v61 = vsel %vm1179_vm8, %v1363_v17, %v1356_v60 }
 0xaba   :  { %1367 = vrot.lane.b32.xlu0 %v1366_v61, %s1792_s14 }
 0xabe   :  { %1372 = vrot.lane.b32.xlu0 %v1762_v50, %s1792_s14 }
 0xb2c   :  { %v1368_v62 = vpop.permute.xlu0 %1367 }
 0xb2d   :  { %v1370_v63 = vmul.f32 %v1368_v62, %v2040_v43 }
 0xb30   :  { %v1373_v20 = vpop.permute.xlu0 %1372 }
 0xb31   :  { %v1375_v0 = vmul.f32 %v1373_v20, %v1370_v63 }
 0xb33   :  { %1377 = vrot.lane.b32.xlu0 %v1375_v0, %s1791_s20 }
 0xba5   :  { %v1378_v2 = vpop.permute.xlu0 %1377 }
 0xba6   :  { %1381 = vst.msk [vmem:[#allocation2] sm:$0x3] %vm1380_vm13, %v1378_v2 }
 0xba7   :  { %1774 = shalt.err (!%p1771_p4)
}
 0xba8   :  { %s1775_s16 = scalar_lea.hbm %s2137_s15, 32 }
 0xba9   :  { %p1776_p5 = scmp.ne.s32.totalorder %s2137_s15, %s1775_s16  ;;  %p1779_p6 = scmp.lt.u32.totalorder %s1775_s16, %s2137_s15 }
 0xbab   :  { %p1781_p7 = pnand %p1779_p6, %p1776_p5 }
 0xbad   :  { %1784 = shalt.err (!%p1781_p7)
}
 0xbae   :  { %1391 = dma.vmem_to_hbm [thread:$0]  %s1389_s28, 32, %s2137_s15, [#allocation3]  }
 0xbaf   :  { %1785 = dma.done.wait [#allocation3], 32  }
 0xbb0   :  { %1786 = vsyncadd [#allocation3], 4294967264 }
 0xbb1   :  { %1395 = vsyncpa [#allocation3], 1 }

</bundles_post_ra>
